<compile_context>
chip_gen: v6e
topology: v6e:2x2x1
jax: 0.10.0
libtpu: 0.0.40
codegen_flags: <defaults>
</compile_context>

<pallas_src>
import functools

import jax
import jax.numpy as jnp
from jax.experimental import pallas as pl
from jax.experimental.pallas import tpu as pltpu


# ---------------------------------------------------------------------------
# Static capability / hardware queries (cached; never wrap the real kernel).
# ---------------------------------------------------------------------------
@functools.lru_cache(maxsize=None)
def _single_buffer_supported():
    """True if pl.BlockSpec(pipeline_mode=pl.Buffered(1)) lowers on this JAX/TPU."""
    if not hasattr(pl, "Buffered"):
        return False
    try:
        spec = pl.BlockSpec((8, 128), lambda i: (0, 0),
                            pipeline_mode=pl.Buffered(1))
    except Exception:
        return False

    def probe(x_ref, o_ref):
        o_ref[...] = x_ref[...] + 1.0

    try:
        fn = pl.pallas_call(
            probe,
            out_shape=jax.ShapeDtypeStruct((8, 128), jnp.float32),
            grid=(2,),
            in_specs=[spec],
            out_specs=pl.BlockSpec((8, 128), lambda i: (0, 0)),
        )
        # Compile-only probe: no execution, cached once.
        jax.jit(fn).lower(jax.ShapeDtypeStruct((8, 128), jnp.float32)).compile()
        return True
    except Exception:
        return False


@functools.lru_cache(maxsize=None)
def _vmem_capacity_bytes():
    try:
        return int(pltpu.get_tpu_info().vmem_capacity_bytes)
    except Exception:
        return 64 * 1024 * 1024          # conservative per-TensorCore (v7x)


def _const_spec(shape, single_buffer):
    """BlockSpec whose block index never changes across the (1-D) grid."""
    index_map = lambda i: (0,) * len(shape)
    if single_buffer:
        # Constant blocks don't need double-buffering (VMEM saver, key on v7x).
        return pl.BlockSpec(shape, index_map, pipeline_mode=pl.Buffered(1))
    return pl.BlockSpec(shape, index_map)


def _recurrence_vmem_bytes(tc, B, E, H, out_bytes, const_bufs):
    """Rough VMEM footprint of the fused kernel for a given time-chunk tc."""
    G = 4 * H
    emb_in = 2 * tc * B * E * 2                    # double-buffered bf16 emb chunk
    out_buf = 2 * tc * B * H * out_bytes           # double-buffered output chunk
    consts = const_bufs * ((E + H) * G * 2         # W_ih^T + W_hh^T (bf16)
                           + G * 4                 # fused bias (f32)
                           + 2 * B * H * 4)        # h0, c0 (f32)
    hn_cn = 2 * B * H * 4                          # resident h_n / c_n blocks
    scratch = tc * B * G * 4 + 2 * B * H * 4       # gates_x scratch + h/c state
    return emb_in + out_buf + consts + hn_cn + scratch


# ---------------------------------------------------------------------------
# Fused Pallas kernel: per grid step = projection of tc timesteps + tc LSTM steps
# ---------------------------------------------------------------------------
def _fused_lstm_kernel(x_ref, wih_ref, whh_ref, b_ref, h0_ref, c0_ref,
                       out_ref, hn_ref, cn_ref,
                       gx_scr, h_scr, c_scr, *, seq_len, apply_mask):
    chunk = pl.program_id(0)
    tc, B, H = out_ref.shape

    @pl.when(chunk == 0)
    def _():
        h_scr[...] = h0_ref[...]
        c_scr[...] = c0_ref[...]

    # Per-chunk input projection: one big MXU matmul amortized over tc steps.
    # bf16 operands, f32 accumulation; gates_x never touches HBM.
    gx_scr[...] = (
        jnp.dot(x_ref[...], wih_ref[...], preferred_element_type=jnp.float32)
        + b_ref[...]
    )

    w_dtype = whh_ref.dtype

    # TODO(synk): bundle-inspect for a per-step W_hh push into the MXU; if
    # present, stage W_hh once per chunk via pltpu.matmul_push_rhs and drive
    # pltpu.matmul_acc_lhs / matmul_pop per step (do NOT hoist whh_ref[...]
    # into vregs -- an (H,4H) bf16 slab would force spills).
    def step(s, carry):
        h_prev, c_prev = carry                                   # f32 (B, H)
        row = pl.multiple_of(s * B, B)
        gates = gx_scr[pl.ds(row, B), :] + jnp.dot(
            h_prev.astype(w_dtype), whh_ref[...],
            preferred_element_type=jnp.float32)
        # Gate layout reordered in the wrapper to [i, f, o, g]: one sigmoid
        # over (B, 3H) and one tanh over (B, H) => 2 EUP launches per step.
        sig = jax.nn.sigmoid(gates[:, :3 * H])
        g = jnp.tanh(gates[:, 3 * H:])
        i = sig[:, 0 * H:1 * H]
        f = sig[:, 1 * H:2 * H]
        o = sig[:, 2 * H:3 * H]
        c = f * c_prev + i * g
        h = o * jnp.tanh(c)
        if apply_mask:                   # T was padded up to a multiple of tc
            valid = (chunk * tc + s) < seq_len
            h = jnp.where(valid, h, h_prev)
            c = jnp.where(valid, c, c_prev)
        out_ref[s] = h.astype(out_ref.dtype)
        return h, c

    h, c = jax.lax.fori_loop(0, tc, step, (h_scr[...], c_scr[...]),
                             unroll=True)
    h_scr[...] = h
    c_scr[...] = c

    @pl.when(chunk == pl.num_programs(0) - 1)
    def _():
        hn_ref[...] = h.astype(hn_ref.dtype)
        cn_ref[...] = c.astype(cn_ref.dtype)


# ---------------------------------------------------------------------------
# Wrapper
# ---------------------------------------------------------------------------
def _reorder_gates(w, H):
    """PyTorch LSTM gate order [i, f, g, o] -> [i, f, o, g] along axis 0."""
    return jnp.concatenate(
        [w[0:H], w[H:2 * H], w[3 * H:4 * H], w[2 * H:3 * H]], axis=0)


def lstm_pallas(emb, w_ih, w_hh, b_ih, b_hh, h0, c0,
                t_chunk=32, out_dtype=jnp.float32):
    """emb: (T, B, E); w_ih: (4H, E); w_hh: (4H, H); b_*: (4H,); h0/c0: (B, H).

    Returns (output (T, B, H) out_dtype, h_n (B, H) f32, c_n (B, H) f32).
    Set out_dtype=jnp.bfloat16 if the downstream consumer accepts bf16 (halves
    the largest HBM write of the kernel).
    """
    T, B, E = emb.shape
    H = h0.shape[-1]
    G = 4 * H
    if (B % 8) or (E % 128) or (H % 128):
        # TODO(synk): pad B to a multiple of 8 and E, H to multiples of 128
        # instead of rejecting (B=8 fills only 8 of 256 MXU rows on v6e/v7x,
        # so larger/padded batches are nearly free per step).
        raise ValueError(
            f"lstm_pallas expects B % 8 == 0 and E, H % 128 == 0 "
            f"(got B={B}, E={E}, H={H}).")

    single = _single_buffer_supported()
    const_bufs = 1 if single else 2
    out_bytes = jnp.dtype(out_dtype).itemsize

    # Time-chunk selection: as large as t_chunk allows, shrunk to fit ~70% of
    # this generation's physical VMEM (v5e/v6e: 128 MiB, v7x: 64 MiB per TC).
    cap = _vmem_capacity_bytes()
    budget = int(cap * 0.7)
    tc = max(1, min(int(t_chunk), T))
    while tc > 1 and _recurrence_vmem_bytes(tc, B, E, H, out_bytes,
                                            const_bufs) > budget:
        tc = max(1, tc // 2)
    vmem_limit = int(min(cap, max(
        32 * 1024 * 1024,
        int(1.5 * _recurrence_vmem_bytes(tc, B, E, H, out_bytes, const_bufs)))))

    # Pad T up to a multiple of tc; padded steps are masked inside the kernel
    # (never decrement tc toward degenerate 1-step chunks).
    n_chunks = -(-T // tc)
    T_pad = n_chunks * tc

    # Gate reorder + bf16 MXU operands (accumulation / gate math / c stay f32).
    wih_t = jnp.transpose(_reorder_gates(w_ih, H)).astype(jnp.bfloat16)  # (E, G)
    whh_t = jnp.transpose(_reorder_gates(w_hh, H)).astype(jnp.bfloat16)  # (H, G)
    bias = _reorder_gates(b_ih + b_hh, H).reshape(1, G).astype(jnp.float32)
    h0f = h0.astype(jnp.float32)
    c0f = c0.astype(jnp.float32)

    x = emb.astype(jnp.bfloat16)                       # no-op if already bf16
    if T_pad != T:
        x = jnp.pad(x, ((0, T_pad - T), (0, 0), (0, 0)))
    x2d = x.reshape(T_pad * B, E)

    kernel = functools.partial(_fused_lstm_kernel,
                               seq_len=T, apply_mask=(T_pad != T))

    out, h_n, c_n = pl.pallas_call(
        kernel,
        out_shape=(
            jax.ShapeDtypeStruct((T_pad, B, H), out_dtype),
            jax.ShapeDtypeStruct((B, H), jnp.float32),
            jax.ShapeDtypeStruct((B, H), jnp.float32),
        ),
        grid_spec=pltpu.PrefetchScalarGridSpec(
            num_scalar_prefetch=0,
            grid=(n_chunks,),
            in_specs=[
                pl.BlockSpec((tc * B, E), lambda i: (i, 0)),     # emb chunk (bf16)
                _const_spec((E, G), single),                     # W_ih^T (bf16)
                _const_spec((H, G), single),                     # W_hh^T (bf16)
                _const_spec((1, G), single),                     # fused bias (f32)
                _const_spec((B, H), single),                     # h0
                _const_spec((B, H), single),                     # c0
            ],
            out_specs=[
                pl.BlockSpec((tc, B, H), lambda i: (i, 0, 0)),   # output chunk
                pl.BlockSpec((B, H), lambda i: (0, 0)),          # h_n
                pl.BlockSpec((B, H), lambda i: (0, 0)),          # c_n
            ],
            scratch_shapes=[
                pltpu.VMEM((tc * B, G), jnp.float32),            # gates_x chunk
                pltpu.VMEM((B, H), jnp.float32),                 # h state
                pltpu.VMEM((B, H), jnp.float32),                 # c state
            ],
        ),
        # NOTE: h0/c0 intentionally NOT aliased to h_n/c_n (buffer-donation of
        # the caller's hidden state is unsafe under jit; saves only 2*(B,H)).
        compiler_params=pltpu.CompilerParams(
            # Time is a serial recurrence.
            # TODO(synk): on v7x (2 TensorCores) co-schedule the reverse
            # direction / next layer's projection / next microbatch on the
            # second core via pl.core_map while this serial phase runs.
            dimension_semantics=("arbitrary",),
            vmem_limit_bytes=vmem_limit,
        ),
    )(x2d, wih_t, whh_t, bias, h0f, c0f)

    return out[:T], h_n, c_n


# ---------------------------------------------------------------------------
# EncoderRNN: parameter construction + forward wrapper
# ---------------------------------------------------------------------------
def init_encoder_params(key, input_size, embedding_size, hidden_size):
    init_param = 0.08
    ks = jax.random.split(key, 5)
    u = lambda k, shape: jax.random.uniform(
        k, shape, jnp.float32, -init_param, init_param)
    return {
        "embedding": u(ks[0], (input_size, embedding_size)),
        "w_ih": u(ks[1], (4 * hidden_size, embedding_size)),
        "w_hh": u(ks[2], (4 * hidden_size, hidden_size)),
        "b_ih": u(ks[3], (4 * hidden_size,)),
        "b_hh": u(ks[4], (4 * hidden_size,)),
    }


def encoder_rnn_forward(params, inputs, hidden, t_chunk=32):
    """inputs: (T, B) int32; hidden: tuple of (1, B, H) -> (output, (h_n, c_n))."""
    h0, c0 = hidden
    # bf16 embedding table so the gather emits bf16 activations directly.
    # TODO(synk): fuse the gather into the Pallas kernel via scalar-prefetched
    # token ids (pl.Element row index_map / manual DMA gather) to avoid
    # materializing (T, B, E) in HBM at production sequence lengths.
    emb = jnp.take(params["embedding"].astype(jnp.bfloat16), inputs, axis=0)
    out, h_n, c_n = lstm_pallas(
        emb, params["w_ih"], params["w_hh"], params["b_ih"], params["b_hh"],
        h0[0], c0[0], t_chunk=t_chunk)
    return out, (h_n[None, :, :], c_n[None, :, :])


# ---------------------------------------------------------------------------
# Pure-JAX reference (f32) for correctness checking
# ---------------------------------------------------------------------------
def lstm_reference(emb, w_ih, w_hh, b_ih, b_hh, h0, c0):
    H = h0.shape[-1]

    def step(carry, x):
        h, c = carry
        gates = x @ w_ih.T + h @ w_hh.T + b_ih + b_hh
        i = jax.nn.sigmoid(gates[:, 0 * H:1 * H])
        f = jax.nn.sigmoid(gates[:, 1 * H:2 * H])
        g = jnp.tanh(gates[:, 2 * H:3 * H])
        o = jax.nn.sigmoid(gates[:, 3 * H:4 * H])
        c = f * c + i * g
        h = o * jnp.tanh(c)
        return (h, c), h

    (h, c), outs = jax.lax.scan(step, (h0, c0), emb)
    return outs, h, c


if __name__ == "__main__":
    # Small, TPU-friendly shapes; SEQ % t_chunk != 0 exercises the padded path.
    VOCAB, EMB, HID = 64, 128, 128
    SEQ, BATCH = 12, 8

    key = jax.random.PRNGKey(0)
    pkey, ikey = jax.random.split(key)
    params = init_encoder_params(pkey, VOCAB, EMB, HID)

    inputs = jax.random.randint(ikey, (SEQ, BATCH), 0, VOCAB, dtype=jnp.int32)
    hidden = (jnp.zeros((1, BATCH, HID), jnp.float32),
              jnp.zeros((1, BATCH, HID), jnp.float32))

    output, (h_n, c_n) = encoder_rnn_forward(params, inputs, hidden, t_chunk=8)
    jax.block_until_ready((output, h_n, c_n))

    assert output.shape == (SEQ, BATCH, HID)
    assert h_n.shape == (1, BATCH, HID) and c_n.shape == (1, BATCH, HID)

    # Correctness vs pure-JAX f32 reference (loose tol: bf16 MXU operands).
    emb_ref = jnp.take(params["embedding"], inputs, axis=0)      # f32 reference
    ref_out, ref_h, ref_c = lstm_reference(
        emb_ref, params["w_ih"], params["w_hh"], params["b_ih"], params["b_hh"],
        hidden[0][0], hidden[1][0])
    assert jnp.allclose(output, ref_out, atol=1e-2, rtol=1e-2)
    assert jnp.allclose(h_n[0], ref_h, atol=1e-2, rtol=1e-2)
    assert jnp.allclose(c_n[0], ref_c, atol=1e-2, rtol=1e-2)

    print("KERNEL_OK")
</pallas_src>

<mosaic_0001>
module attributes {stable_mosaic.version = 11 : i64} {
  func.func @_fused_lstm_kernel(%arg0: i32, %arg1: memref<64x128xbf16, #tpu.memory_space<vmem>>, %arg2: memref<128x512xbf16, #tpu.memory_space<vmem>>, %arg3: memref<128x512xbf16, #tpu.memory_space<vmem>>, %arg4: memref<1x512xf32, #tpu.memory_space<vmem>>, %arg5: memref<8x128xf32, #tpu.memory_space<vmem>>, %arg6: memref<8x128xf32, #tpu.memory_space<vmem>>, %arg7: memref<8x8x128xf32, #tpu.memory_space<vmem>>, %arg8: memref<8x128xf32, #tpu.memory_space<vmem>>, %arg9: memref<8x128xf32, #tpu.memory_space<vmem>>, %arg10: memref<64x512xf32, #tpu.memory_space<vmem>>, %arg11: memref<8x128xf32, #tpu.memory_space<vmem>>, %arg12: memref<8x128xf32, #tpu.memory_space<vmem>>) attributes {dimension_semantics = [#tpu.dimension_semantics<arbitrary>], iteration_bounds = array<i64: 2>, scalar_prefetch = 0 : i64, scratch_operands = 3 : i64, tpu.core_type = #tpu.core_type<tc>, window_params = [{transform_indices = @transform_0, window_bounds = array<i64: 64, 128>}, {pipeline_mode = #tpu.pipeline_mode<synchronous>, transform_indices = @transform_1, window_bounds = array<i64: 128, 512>}, {pipeline_mode = #tpu.pipeline_mode<synchronous>, transform_indices = @transform_2, window_bounds = array<i64: 128, 512>}, {pipeline_mode = #tpu.pipeline_mode<synchronous>, transform_indices = @transform_3, window_bounds = array<i64: 1, 512>}, {pipeline_mode = #tpu.pipeline_mode<synchronous>, transform_indices = @transform_4, window_bounds = array<i64: 8, 128>}, {pipeline_mode = #tpu.pipeline_mode<synchronous>, transform_indices = @transform_5, window_bounds = array<i64: 8, 128>}, {transform_indices = @transform_6, window_bounds = array<i64: 8, 8, 128>}, {pipeline_mode = #tpu.pipeline_mode<synchronous>, transform_indices = @transform_7, window_bounds = array<i64: 8, 128>}, {pipeline_mode = #tpu.pipeline_mode<synchronous>, transform_indices = @transform_8, window_bounds = array<i64: 8, 128>}]} {
    %c0_i32 = arith.constant 0 : i32
    %0 = arith.cmpi eq, %arg0, %c0_i32 : i32
    %1 = arith.extui %0 : i1 to i32
    %c0_i32_0 = arith.constant 0 : i32
    %2 = arith.cmpi ne, %1, %c0_i32_0 : i32
    scf.if %2 {
      %c0_98 = arith.constant 0 : index
      %c0_99 = arith.constant 0 : index
      %281 = vector.load %arg5[%c0_98, %c0_99] : memref<8x128xf32, #tpu.memory_space<vmem>>, vector<8x128xf32>
      %c0_100 = arith.constant 0 : index
      %c0_101 = arith.constant 0 : index
      %282 = vector.load %arg11[%c0_100, %c0_101] : memref<8x128xf32, #tpu.memory_space<vmem>>, vector<8x128xf32>
      tpu.vector_store %arg11[%c0_100, %c0_101], %281 {strides = array<i32>} : memref<8x128xf32, #tpu.memory_space<vmem>>, vector<8x128xf32>,
      %c0_102 = arith.constant 0 : index
      %c0_103 = arith.constant 0 : index
      %283 = vector.load %arg6[%c0_102, %c0_103] : memref<8x128xf32, #tpu.memory_space<vmem>>, vector<8x128xf32>
      %c0_104 = arith.constant 0 : index
      %c0_105 = arith.constant 0 : index
      %284 = vector.load %arg12[%c0_104, %c0_105] : memref<8x128xf32, #tpu.memory_space<vmem>>, vector<8x128xf32>
      tpu.vector_store %arg12[%c0_104, %c0_105], %283 {strides = array<i32>} : memref<8x128xf32, #tpu.memory_space<vmem>>, vector<8x128xf32>,
    } else {
    }
    %c0 = arith.constant 0 : index
    %c0_1 = arith.constant 0 : index
    %3 = vector.load %arg1[%c0, %c0_1] : memref<64x128xbf16, #tpu.memory_space<vmem>>, vector<64x128xbf16>
    %c0_2 = arith.constant 0 : index
    %c0_3 = arith.constant 0 : index
    %4 = vector.load %arg2[%c0_2, %c0_3] : memref<128x512xbf16, #tpu.memory_space<vmem>>, vector<128x512xbf16>
    %cst = arith.constant dense<0.000000e+00> : vector<64x512xf32>
    %5 = tpu.matmul %3, %4, %cst {dimension_numbers = #tpu.dot_dimension_numbers<[1], [0], [0], [1], [0, 0, 1, 1], [], []>} : vector<64x128xbf16>, vector<128x512xbf16>, vector<64x512xf32> -> vector<64x512xf32>
    %c0_4 = arith.constant 0 : index
    %c0_5 = arith.constant 0 : index
    %6 = vector.load %arg4[%c0_4, %c0_5] : memref<1x512xf32, #tpu.memory_space<vmem>>, vector<1x512xf32>
    %7 = vector.broadcast %6 : vector<1x512xf32> to vector<64x512xf32>
    %8 = arith.addf %5, %7 : vector<64x512xf32>
    %c0_6 = arith.constant 0 : index
    %c0_7 = arith.constant 0 : index
    %9 = vector.load %arg10[%c0_6, %c0_7] : memref<64x512xf32, #tpu.memory_space<vmem>>, vector<64x512xf32>
    tpu.vector_store %arg10[%c0_6, %c0_7], %8 {strides = array<i32>} : memref<64x512xf32, #tpu.memory_space<vmem>>, vector<64x512xf32>,
    %c0_8 = arith.constant 0 : index
    %c0_9 = arith.constant 0 : index
    %10 = vector.load %arg11[%c0_8, %c0_9] : memref<8x128xf32, #tpu.memory_space<vmem>>, vector<8x128xf32>
    %c0_10 = arith.constant 0 : index
    %c0_11 = arith.constant 0 : index
    %11 = vector.load %arg12[%c0_10, %c0_11] : memref<8x128xf32, #tpu.memory_space<vmem>>, vector<8x128xf32>
    %c0_i32_12 = arith.constant 0 : i32
    %c8_i32 = arith.constant 8 : i32
    %12 = arith.muli %c0_i32_12, %c8_i32 : i32
    %13 = tpu.assume_multiple %12, 8 : i32
    %14 = arith.index_cast %13 : i32 to index
    %c0_13 = arith.constant 0 : index
    %15 = vector.load %arg10[%14, %c0_13] : memref<64x512xf32, #tpu.memory_space<vmem>>, vector<8x512xf32>
    %16 = arith.truncf %10 : vector<8x128xf32> to vector<8x128xbf16>
    %c0_14 = arith.constant 0 : index
    %c0_15 = arith.constant 0 : index
    %17 = vector.load %arg3[%c0_14, %c0_15] : memref<128x512xbf16, #tpu.memory_space<vmem>>, vector<128x512xbf16>
    %cst_16 = arith.constant dense<0.000000e+00> : vector<8x512xf32>
    %18 = tpu.matmul %16, %17, %cst_16 {dimension_numbers = #tpu.dot_dimension_numbers<[1], [0], [0], [1], [0, 0, 1, 1], [], []>} : vector<8x128xbf16>, vector<128x512xbf16>, vector<8x512xf32> -> vector<8x512xf32>
    %19 = arith.addf %15, %18 : vector<8x512xf32>
    %20 = vector.extract_strided_slice %19 {offsets = [0, 0], sizes = [8, 384], strides = [1, 1]} : vector<8x512xf32> to vector<8x384xf32>
    %21 = arith.negf %20 : vector<8x384xf32>
    %22 = math.exp %21 : vector<8x384xf32>
    %cst_17 = arith.constant 1.000000e+00 : f32
    %23 = vector.broadcast %cst_17 : f32 to vector<8x384xf32>
    %24 = arith.addf %23, %22 : vector<8x384xf32>
    %25 = arith.divf %23, %24 : vector<8x384xf32>
    %26 = vector.extract_strided_slice %19 {offsets = [0, 384], sizes = [8, 128], strides = [1, 1]} : vector<8x512xf32> to vector<8x128xf32>
    %27 = math.tanh %26 : vector<8x128xf32>
    %28 = vector.extract_strided_slice %25 {offsets = [0, 0], sizes = [8, 128], strides = [1, 1]} : vector<8x384xf32> to vector<8x128xf32>
    %29 = vector.extract_strided_slice %25 {offsets = [0, 128], sizes = [8, 128], strides = [1, 1]} : vector<8x384xf32> to vector<8x128xf32>
    %30 = vector.extract_strided_slice %25 {offsets = [0, 256], sizes = [8, 128], strides = [1, 1]} : vector<8x384xf32> to vector<8x128xf32>
    %31 = arith.mulf %29, %11 : vector<8x128xf32>
    %32 = arith.mulf %28, %27 : vector<8x128xf32>
    %33 = arith.addf %31, %32 : vector<8x128xf32>
    %34 = math.tanh %33 : vector<8x128xf32>
    %35 = arith.mulf %30, %34 : vector<8x128xf32>
    %c8_i32_18 = arith.constant 8 : i32
    %36 = arith.muli %arg0, %c8_i32_18 : i32
    %37 = arith.addi %36, %c0_i32_12 : i32
    %c12_i32 = arith.constant 12 : i32
    %38 = arith.cmpi slt, %37, %c12_i32 : i32
    %39 = arith.select %38, %35, %10 : vector<8x128xf32>
    %40 = arith.select %38, %33, %11 : vector<8x128xf32>
    %41 = arith.index_cast %c0_i32_12 : i32 to index
    %c0_19 = arith.constant 0 : index
    %c0_20 = arith.constant 0 : index
    %42 = vector.load %arg7[%41, %c0_19, %c0_20] : memref<8x8x128xf32, #tpu.memory_space<vmem>>, vector<1x8x128xf32>
    %43 = vector.shape_cast %42 : vector<1x8x128xf32> to vector<8x128xf32>
    %44 = vector.shape_cast %39 : vector<8x128xf32> to vector<1x8x128xf32>
    tpu.vector_store %arg7[%41, %c0_19, %c0_20], %44 {strides = array<i32>} : memref<8x8x128xf32, #tpu.memory_space<vmem>>, vector<1x8x128xf32>,
    %c1_i32 = arith.constant 1 : i32
    %c8_i32_21 = arith.constant 8 : i32
    %45 = arith.muli %c1_i32, %c8_i32_21 : i32
    %46 = tpu.assume_multiple %45, 8 : i32
    %47 = arith.index_cast %46 : i32 to index
    %c0_22 = arith.constant 0 : index
    %48 = vector.load %arg10[%47, %c0_22] : memref<64x512xf32, #tpu.memory_space<vmem>>, vector<8x512xf32>
    %49 = arith.truncf %39 : vector<8x128xf32> to vector<8x128xbf16>
    %c0_23 = arith.constant 0 : index
    %c0_24 = arith.constant 0 : index
    %50 = vector.load %arg3[%c0_23, %c0_24] : memref<128x512xbf16, #tpu.memory_space<vmem>>, vector<128x512xbf16>
    %cst_25 = arith.constant dense<0.000000e+00> : vector<8x512xf32>
    %51 = tpu.matmul %49, %50, %cst_25 {dimension_numbers = #tpu.dot_dimension_numbers<[1], [0], [0], [1], [0, 0, 1, 1], [], []>} : vector<8x128xbf16>, vector<128x512xbf16>, vector<8x512xf32> -> vector<8x512xf32>
    %52 = arith.addf %48, %51 : vector<8x512xf32>
    %53 = vector.extract_strided_slice %52 {offsets = [0, 0], sizes = [8, 384], strides = [1, 1]} : vector<8x512xf32> to vector<8x384xf32>
    %54 = arith.negf %53 : vector<8x384xf32>
    %55 = math.exp %54 : vector<8x384xf32>
    %cst_26 = arith.constant 1.000000e+00 : f32
    %56 = vector.broadcast %cst_26 : f32 to vector<8x384xf32>
    %57 = arith.addf %56, %55 : vector<8x384xf32>
    %58 = arith.divf %56, %57 : vector<8x384xf32>
    %59 = vector.extract_strided_slice %52 {offsets = [0, 384], sizes = [8, 128], strides = [1, 1]} : vector<8x512xf32> to vector<8x128xf32>
    %60 = math.tanh %59 : vector<8x128xf32>
    %61 = vector.extract_strided_slice %58 {offsets = [0, 0], sizes = [8, 128], strides = [1, 1]} : vector<8x384xf32> to vector<8x128xf32>
    %62 = vector.extract_strided_slice %58 {offsets = [0, 128], sizes = [8, 128], strides = [1, 1]} : vector<8x384xf32> to vector<8x128xf32>
    %63 = vector.extract_strided_slice %58 {offsets = [0, 256], sizes = [8, 128], strides = [1, 1]} : vector<8x384xf32> to vector<8x128xf32>
    %64 = arith.mulf %62, %40 : vector<8x128xf32>
    %65 = arith.mulf %61, %60 : vector<8x128xf32>
    %66 = arith.addf %64, %65 : vector<8x128xf32>
    %67 = math.tanh %66 : vector<8x128xf32>
    %68 = arith.mulf %63, %67 : vector<8x128xf32>
    %c8_i32_27 = arith.constant 8 : i32
    %69 = arith.muli %arg0, %c8_i32_27 : i32
    %70 = arith.addi %69, %c1_i32 : i32
    %c12_i32_28 = arith.constant 12 : i32
    %71 = arith.cmpi slt, %70, %c12_i32_28 : i32
    %72 = arith.select %71, %68, %39 : vector<8x128xf32>
    %73 = arith.select %71, %66, %40 : vector<8x128xf32>
    %74 = arith.index_cast %c1_i32 : i32 to index
    %c0_29 = arith.constant 0 : index
    %c0_30 = arith.constant 0 : index
    %75 = vector.load %arg7[%74, %c0_29, %c0_30] : memref<8x8x128xf32, #tpu.memory_space<vmem>>, vector<1x8x128xf32>
    %76 = vector.shape_cast %75 : vector<1x8x128xf32> to vector<8x128xf32>
    %77 = vector.shape_cast %72 : vector<8x128xf32> to vector<1x8x128xf32>
    tpu.vector_store %arg7[%74, %c0_29, %c0_30], %77 {strides = array<i32>} : memref<8x8x128xf32, #tpu.memory_space<vmem>>, vector<1x8x128xf32>,
    %c2_i32 = arith.constant 2 : i32
    %c8_i32_31 = arith.constant 8 : i32
    %78 = arith.muli %c2_i32, %c8_i32_31 : i32
    %79 = tpu.assume_multiple %78, 8 : i32
    %80 = arith.index_cast %79 : i32 to index
    %c0_32 = arith.constant 0 : index
    %81 = vector.load %arg10[%80, %c0_32] : memref<64x512xf32, #tpu.memory_space<vmem>>, vector<8x512xf32>
    %82 = arith.truncf %72 : vector<8x128xf32> to vector<8x128xbf16>
    %c0_33 = arith.constant 0 : index
    %c0_34 = arith.constant 0 : index
    %83 = vector.load %arg3[%c0_33, %c0_34] : memref<128x512xbf16, #tpu.memory_space<vmem>>, vector<128x512xbf16>
    %cst_35 = arith.constant dense<0.000000e+00> : vector<8x512xf32>
    %84 = tpu.matmul %82, %83, %cst_35 {dimension_numbers = #tpu.dot_dimension_numbers<[1], [0], [0], [1], [0, 0, 1, 1], [], []>} : vector<8x128xbf16>, vector<128x512xbf16>, vector<8x512xf32> -> vector<8x512xf32>
    %85 = arith.addf %81, %84 : vector<8x512xf32>
    %86 = vector.extract_strided_slice %85 {offsets = [0, 0], sizes = [8, 384], strides = [1, 1]} : vector<8x512xf32> to vector<8x384xf32>
    %87 = arith.negf %86 : vector<8x384xf32>
    %88 = math.exp %87 : vector<8x384xf32>
    %cst_36 = arith.constant 1.000000e+00 : f32
    %89 = vector.broadcast %cst_36 : f32 to vector<8x384xf32>
    %90 = arith.addf %89, %88 : vector<8x384xf32>
    %91 = arith.divf %89, %90 : vector<8x384xf32>
    %92 = vector.extract_strided_slice %85 {offsets = [0, 384], sizes = [8, 128], strides = [1, 1]} : vector<8x512xf32> to vector<8x128xf32>
    %93 = math.tanh %92 : vector<8x128xf32>
    %94 = vector.extract_strided_slice %91 {offsets = [0, 0], sizes = [8, 128], strides = [1, 1]} : vector<8x384xf32> to vector<8x128xf32>
    %95 = vector.extract_strided_slice %91 {offsets = [0, 128], sizes = [8, 128], strides = [1, 1]} : vector<8x384xf32> to vector<8x128xf32>
    %96 = vector.extract_strided_slice %91 {offsets = [0, 256], sizes = [8, 128], strides = [1, 1]} : vector<8x384xf32> to vector<8x128xf32>
    %97 = arith.mulf %95, %73 : vector<8x128xf32>
    %98 = arith.mulf %94, %93 : vector<8x128xf32>
    %99 = arith.addf %97, %98 : vector<8x128xf32>
    %100 = math.tanh %99 : vector<8x128xf32>
    %101 = arith.mulf %96, %100 : vector<8x128xf32>
    %c8_i32_37 = arith.constant 8 : i32
    %102 = arith.muli %arg0, %c8_i32_37 : i32
    %103 = arith.addi %102, %c2_i32 : i32
    %c12_i32_38 = arith.constant 12 : i32
    %104 = arith.cmpi slt, %103, %c12_i32_38 : i32
    %105 = arith.select %104, %101, %72 : vector<8x128xf32>
    %106 = arith.select %104, %99, %73 : vector<8x128xf32>
    %107 = arith.index_cast %c2_i32 : i32 to index
    %c0_39 = arith.constant 0 : index
    %c0_40 = arith.constant 0 : index
    %108 = vector.load %arg7[%107, %c0_39, %c0_40] : memref<8x8x128xf32, #tpu.memory_space<vmem>>, vector<1x8x128xf32>
    %109 = vector.shape_cast %108 : vector<1x8x128xf32> to vector<8x128xf32>
    %110 = vector.shape_cast %105 : vector<8x128xf32> to vector<1x8x128xf32>
    tpu.vector_store %arg7[%107, %c0_39, %c0_40], %110 {strides = array<i32>} : memref<8x8x128xf32, #tpu.memory_space<vmem>>, vector<1x8x128xf32>,
    %c3_i32 = arith.constant 3 : i32
    %c8_i32_41 = arith.constant 8 : i32
    %111 = arith.muli %c3_i32, %c8_i32_41 : i32
    %112 = tpu.assume_multiple %111, 8 : i32
    %113 = arith.index_cast %112 : i32 to index
    %c0_42 = arith.constant 0 : index
    %114 = vector.load %arg10[%113, %c0_42] : memref<64x512xf32, #tpu.memory_space<vmem>>, vector<8x512xf32>
    %115 = arith.truncf %105 : vector<8x128xf32> to vector<8x128xbf16>
    %c0_43 = arith.constant 0 : index
    %c0_44 = arith.constant 0 : index
    %116 = vector.load %arg3[%c0_43, %c0_44] : memref<128x512xbf16, #tpu.memory_space<vmem>>, vector<128x512xbf16>
    %cst_45 = arith.constant dense<0.000000e+00> : vector<8x512xf32>
    %117 = tpu.matmul %115, %116, %cst_45 {dimension_numbers = #tpu.dot_dimension_numbers<[1], [0], [0], [1], [0, 0, 1, 1], [], []>} : vector<8x128xbf16>, vector<128x512xbf16>, vector<8x512xf32> -> vector<8x512xf32>
    %118 = arith.addf %114, %117 : vector<8x512xf32>
    %119 = vector.extract_strided_slice %118 {offsets = [0, 0], sizes = [8, 384], strides = [1, 1]} : vector<8x512xf32> to vector<8x384xf32>
    %120 = arith.negf %119 : vector<8x384xf32>
    %121 = math.exp %120 : vector<8x384xf32>
    %cst_46 = arith.constant 1.000000e+00 : f32
    %122 = vector.broadcast %cst_46 : f32 to vector<8x384xf32>
    %123 = arith.addf %122, %121 : vector<8x384xf32>
    %124 = arith.divf %122, %123 : vector<8x384xf32>
    %125 = vector.extract_strided_slice %118 {offsets = [0, 384], sizes = [8, 128], strides = [1, 1]} : vector<8x512xf32> to vector<8x128xf32>
    %126 = math.tanh %125 : vector<8x128xf32>
    %127 = vector.extract_strided_slice %124 {offsets = [0, 0], sizes = [8, 128], strides = [1, 1]} : vector<8x384xf32> to vector<8x128xf32>
    %128 = vector.extract_strided_slice %124 {offsets = [0, 128], sizes = [8, 128], strides = [1, 1]} : vector<8x384xf32> to vector<8x128xf32>
    %129 = vector.extract_strided_slice %124 {offsets = [0, 256], sizes = [8, 128], strides = [1, 1]} : vector<8x384xf32> to vector<8x128xf32>
    %130 = arith.mulf %128, %106 : vector<8x128xf32>
    %131 = arith.mulf %127, %126 : vector<8x128xf32>
    %132 = arith.addf %130, %131 : vector<8x128xf32>
    %133 = math.tanh %132 : vector<8x128xf32>
    %134 = arith.mulf %129, %133 : vector<8x128xf32>
    %c8_i32_47 = arith.constant 8 : i32
    %135 = arith.muli %arg0, %c8_i32_47 : i32
    %136 = arith.addi %135, %c3_i32 : i32
    %c12_i32_48 = arith.constant 12 : i32
    %137 = arith.cmpi slt, %136, %c12_i32_48 : i32
    %138 = arith.select %137, %134, %105 : vector<8x128xf32>
    %139 = arith.select %137, %132, %106 : vector<8x128xf32>
    %140 = arith.index_cast %c3_i32 : i32 to index
    %c0_49 = arith.constant 0 : index
    %c0_50 = arith.constant 0 : index
    %141 = vector.load %arg7[%140, %c0_49, %c0_50] : memref<8x8x128xf32, #tpu.memory_space<vmem>>, vector<1x8x128xf32>
    %142 = vector.shape_cast %141 : vector<1x8x128xf32> to vector<8x128xf32>
    %143 = vector.shape_cast %138 : vector<8x128xf32> to vector<1x8x128xf32>
    tpu.vector_store %arg7[%140, %c0_49, %c0_50], %143 {strides = array<i32>} : memref<8x8x128xf32, #tpu.memory_space<vmem>>, vector<1x8x128xf32>,
    %c4_i32 = arith.constant 4 : i32
    %c8_i32_51 = arith.constant 8 : i32
    %144 = arith.muli %c4_i32, %c8_i32_51 : i32
    %145 = tpu.assume_multiple %144, 8 : i32
    %146 = arith.index_cast %145 : i32 to index
    %c0_52 = arith.constant 0 : index
    %147 = vector.load %arg10[%146, %c0_52] : memref<64x512xf32, #tpu.memory_space<vmem>>, vector<8x512xf32>
    %148 = arith.truncf %138 : vector<8x128xf32> to vector<8x128xbf16>
    %c0_53 = arith.constant 0 : index
    %c0_54 = arith.constant 0 : index
    %149 = vector.load %arg3[%c0_53, %c0_54] : memref<128x512xbf16, #tpu.memory_space<vmem>>, vector<128x512xbf16>
    %cst_55 = arith.constant dense<0.000000e+00> : vector<8x512xf32>
    %150 = tpu.matmul %148, %149, %cst_55 {dimension_numbers = #tpu.dot_dimension_numbers<[1], [0], [0], [1], [0, 0, 1, 1], [], []>} : vector<8x128xbf16>, vector<128x512xbf16>, vector<8x512xf32> -> vector<8x512xf32>
    %151 = arith.addf %147, %150 : vector<8x512xf32>
    %152 = vector.extract_strided_slice %151 {offsets = [0, 0], sizes = [8, 384], strides = [1, 1]} : vector<8x512xf32> to vector<8x384xf32>
    %153 = arith.negf %152 : vector<8x384xf32>
    %154 = math.exp %153 : vector<8x384xf32>
    %cst_56 = arith.constant 1.000000e+00 : f32
    %155 = vector.broadcast %cst_56 : f32 to vector<8x384xf32>
    %156 = arith.addf %155, %154 : vector<8x384xf32>
    %157 = arith.divf %155, %156 : vector<8x384xf32>
    %158 = vector.extract_strided_slice %151 {offsets = [0, 384], sizes = [8, 128], strides = [1, 1]} : vector<8x512xf32> to vector<8x128xf32>
    %159 = math.tanh %158 : vector<8x128xf32>
    %160 = vector.extract_strided_slice %157 {offsets = [0, 0], sizes = [8, 128], strides = [1, 1]} : vector<8x384xf32> to vector<8x128xf32>
    %161 = vector.extract_strided_slice %157 {offsets = [0, 128], sizes = [8, 128], strides = [1, 1]} : vector<8x384xf32> to vector<8x128xf32>
    %162 = vector.extract_strided_slice %157 {offsets = [0, 256], sizes = [8, 128], strides = [1, 1]} : vector<8x384xf32> to vector<8x128xf32>
    %163 = arith.mulf %161, %139 : vector<8x128xf32>
    %164 = arith.mulf %160, %159 : vector<8x128xf32>
    %165 = arith.addf %163, %164 : vector<8x128xf32>
    %166 = math.tanh %165 : vector<8x128xf32>
    %167 = arith.mulf %162, %166 : vector<8x128xf32>
    %c8_i32_57 = arith.constant 8 : i32
    %168 = arith.muli %arg0, %c8_i32_57 : i32
    %169 = arith.addi %168, %c4_i32 : i32
    %c12_i32_58 = arith.constant 12 : i32
    %170 = arith.cmpi slt, %169, %c12_i32_58 : i32
    %171 = arith.select %170, %167, %138 : vector<8x128xf32>
    %172 = arith.select %170, %165, %139 : vector<8x128xf32>
    %173 = arith.index_cast %c4_i32 : i32 to index
    %c0_59 = arith.constant 0 : index
    %c0_60 = arith.constant 0 : index
    %174 = vector.load %arg7[%173, %c0_59, %c0_60] : memref<8x8x128xf32, #tpu.memory_space<vmem>>, vector<1x8x128xf32>
    %175 = vector.shape_cast %174 : vector<1x8x128xf32> to vector<8x128xf32>
    %176 = vector.shape_cast %171 : vector<8x128xf32> to vector<1x8x128xf32>
    tpu.vector_store %arg7[%173, %c0_59, %c0_60], %176 {strides = array<i32>} : memref<8x8x128xf32, #tpu.memory_space<vmem>>, vector<1x8x128xf32>,
    %c5_i32 = arith.constant 5 : i32
    %c8_i32_61 = arith.constant 8 : i32
    %177 = arith.muli %c5_i32, %c8_i32_61 : i32
    %178 = tpu.assume_multiple %177, 8 : i32
    %179 = arith.index_cast %178 : i32 to index
    %c0_62 = arith.constant 0 : index
    %180 = vector.load %arg10[%179, %c0_62] : memref<64x512xf32, #tpu.memory_space<vmem>>, vector<8x512xf32>
    %181 = arith.truncf %171 : vector<8x128xf32> to vector<8x128xbf16>
    %c0_63 = arith.constant 0 : index
    %c0_64 = arith.constant 0 : index
    %182 = vector.load %arg3[%c0_63, %c0_64] : memref<128x512xbf16, #tpu.memory_space<vmem>>, vector<128x512xbf16>
    %cst_65 = arith.constant dense<0.000000e+00> : vector<8x512xf32>
    %183 = tpu.matmul %181, %182, %cst_65 {dimension_numbers = #tpu.dot_dimension_numbers<[1], [0], [0], [1], [0, 0, 1, 1], [], []>} : vector<8x128xbf16>, vector<128x512xbf16>, vector<8x512xf32> -> vector<8x512xf32>
    %184 = arith.addf %180, %183 : vector<8x512xf32>
    %185 = vector.extract_strided_slice %184 {offsets = [0, 0], sizes = [8, 384], strides = [1, 1]} : vector<8x512xf32> to vector<8x384xf32>
    %186 = arith.negf %185 : vector<8x384xf32>
    %187 = math.exp %186 : vector<8x384xf32>
    %cst_66 = arith.constant 1.000000e+00 : f32
    %188 = vector.broadcast %cst_66 : f32 to vector<8x384xf32>
    %189 = arith.addf %188, %187 : vector<8x384xf32>
    %190 = arith.divf %188, %189 : vector<8x384xf32>
    %191 = vector.extract_strided_slice %184 {offsets = [0, 384], sizes = [8, 128], strides = [1, 1]} : vector<8x512xf32> to vector<8x128xf32>
    %192 = math.tanh %191 : vector<8x128xf32>
    %193 = vector.extract_strided_slice %190 {offsets = [0, 0], sizes = [8, 128], strides = [1, 1]} : vector<8x384xf32> to vector<8x128xf32>
    %194 = vector.extract_strided_slice %190 {offsets = [0, 128], sizes = [8, 128], strides = [1, 1]} : vector<8x384xf32> to vector<8x128xf32>
    %195 = vector.extract_strided_slice %190 {offsets = [0, 256], sizes = [8, 128], strides = [1, 1]} : vector<8x384xf32> to vector<8x128xf32>
    %196 = arith.mulf %194, %172 : vector<8x128xf32>
    %197 = arith.mulf %193, %192 : vector<8x128xf32>
    %198 = arith.addf %196, %197 : vector<8x128xf32>
    %199 = math.tanh %198 : vector<8x128xf32>
    %200 = arith.mulf %195, %199 : vector<8x128xf32>
    %c8_i32_67 = arith.constant 8 : i32
    %201 = arith.muli %arg0, %c8_i32_67 : i32
    %202 = arith.addi %201, %c5_i32 : i32
    %c12_i32_68 = arith.constant 12 : i32
    %203 = arith.cmpi slt, %202, %c12_i32_68 : i32
    %204 = arith.select %203, %200, %171 : vector<8x128xf32>
    %205 = arith.select %203, %198, %172 : vector<8x128xf32>
    %206 = arith.index_cast %c5_i32 : i32 to index
    %c0_69 = arith.constant 0 : index
    %c0_70 = arith.constant 0 : index
    %207 = vector.load %arg7[%206, %c0_69, %c0_70] : memref<8x8x128xf32, #tpu.memory_space<vmem>>, vector<1x8x128xf32>
    %208 = vector.shape_cast %207 : vector<1x8x128xf32> to vector<8x128xf32>
    %209 = vector.shape_cast %204 : vector<8x128xf32> to vector<1x8x128xf32>
    tpu.vector_store %arg7[%206, %c0_69, %c0_70], %209 {strides = array<i32>} : memref<8x8x128xf32, #tpu.memory_space<vmem>>, vector<1x8x128xf32>,
    %c6_i32 = arith.constant 6 : i32
    %c8_i32_71 = arith.constant 8 : i32
    %210 = arith.muli %c6_i32, %c8_i32_71 : i32
    %211 = tpu.assume_multiple %210, 8 : i32
    %212 = arith.index_cast %211 : i32 to index
    %c0_72 = arith.constant 0 : index
    %213 = vector.load %arg10[%212, %c0_72] : memref<64x512xf32, #tpu.memory_space<vmem>>, vector<8x512xf32>
    %214 = arith.truncf %204 : vector<8x128xf32> to vector<8x128xbf16>
    %c0_73 = arith.constant 0 : index
    %c0_74 = arith.constant 0 : index
    %215 = vector.load %arg3[%c0_73, %c0_74] : memref<128x512xbf16, #tpu.memory_space<vmem>>, vector<128x512xbf16>
    %cst_75 = arith.constant dense<0.000000e+00> : vector<8x512xf32>
    %216 = tpu.matmul %214, %215, %cst_75 {dimension_numbers = #tpu.dot_dimension_numbers<[1], [0], [0], [1], [0, 0, 1, 1], [], []>} : vector<8x128xbf16>, vector<128x512xbf16>, vector<8x512xf32> -> vector<8x512xf32>
    %217 = arith.addf %213, %216 : vector<8x512xf32>
    %218 = vector.extract_strided_slice %217 {offsets = [0, 0], sizes = [8, 384], strides = [1, 1]} : vector<8x512xf32> to vector<8x384xf32>
    %219 = arith.negf %218 : vector<8x384xf32>
    %220 = math.exp %219 : vector<8x384xf32>
    %cst_76 = arith.constant 1.000000e+00 : f32
    %221 = vector.broadcast %cst_76 : f32 to vector<8x384xf32>
    %222 = arith.addf %221, %220 : vector<8x384xf32>
    %223 = arith.divf %221, %222 : vector<8x384xf32>
    %224 = vector.extract_strided_slice %217 {offsets = [0, 384], sizes = [8, 128], strides = [1, 1]} : vector<8x512xf32> to vector<8x128xf32>
    %225 = math.tanh %224 : vector<8x128xf32>
    %226 = vector.extract_strided_slice %223 {offsets = [0, 0], sizes = [8, 128], strides = [1, 1]} : vector<8x384xf32> to vector<8x128xf32>
    %227 = vector.extract_strided_slice %223 {offsets = [0, 128], sizes = [8, 128], strides = [1, 1]} : vector<8x384xf32> to vector<8x128xf32>
    %228 = vector.extract_strided_slice %223 {offsets = [0, 256], sizes = [8, 128], strides = [1, 1]} : vector<8x384xf32> to vector<8x128xf32>
    %229 = arith.mulf %227, %205 : vector<8x128xf32>
    %230 = arith.mulf %226, %225 : vector<8x128xf32>
    %231 = arith.addf %229, %230 : vector<8x128xf32>
    %232 = math.tanh %231 : vector<8x128xf32>
    %233 = arith.mulf %228, %232 : vector<8x128xf32>
    %c8_i32_77 = arith.constant 8 : i32
    %234 = arith.muli %arg0, %c8_i32_77 : i32
    %235 = arith.addi %234, %c6_i32 : i32
    %c12_i32_78 = arith.constant 12 : i32
    %236 = arith.cmpi slt, %235, %c12_i32_78 : i32
    %237 = arith.select %236, %233, %204 : vector<8x128xf32>
    %238 = arith.select %236, %231, %205 : vector<8x128xf32>
    %239 = arith.index_cast %c6_i32 : i32 to index
    %c0_79 = arith.constant 0 : index
    %c0_80 = arith.constant 0 : index
    %240 = vector.load %arg7[%239, %c0_79, %c0_80] : memref<8x8x128xf32, #tpu.memory_space<vmem>>, vector<1x8x128xf32>
    %241 = vector.shape_cast %240 : vector<1x8x128xf32> to vector<8x128xf32>
    %242 = vector.shape_cast %237 : vector<8x128xf32> to vector<1x8x128xf32>
    tpu.vector_store %arg7[%239, %c0_79, %c0_80], %242 {strides = array<i32>} : memref<8x8x128xf32, #tpu.memory_space<vmem>>, vector<1x8x128xf32>,
    %c7_i32 = arith.constant 7 : i32
    %c8_i32_81 = arith.constant 8 : i32
    %243 = arith.muli %c7_i32, %c8_i32_81 : i32
    %244 = tpu.assume_multiple %243, 8 : i32
    %245 = arith.index_cast %244 : i32 to index
    %c0_82 = arith.constant 0 : index
    %246 = vector.load %arg10[%245, %c0_82] : memref<64x512xf32, #tpu.memory_space<vmem>>, vector<8x512xf32>
    %247 = arith.truncf %237 : vector<8x128xf32> to vector<8x128xbf16>
    %c0_83 = arith.constant 0 : index
    %c0_84 = arith.constant 0 : index
    %248 = vector.load %arg3[%c0_83, %c0_84] : memref<128x512xbf16, #tpu.memory_space<vmem>>, vector<128x512xbf16>
    %cst_85 = arith.constant dense<0.000000e+00> : vector<8x512xf32>
    %249 = tpu.matmul %247, %248, %cst_85 {dimension_numbers = #tpu.dot_dimension_numbers<[1], [0], [0], [1], [0, 0, 1, 1], [], []>} : vector<8x128xbf16>, vector<128x512xbf16>, vector<8x512xf32> -> vector<8x512xf32>
    %250 = arith.addf %246, %249 : vector<8x512xf32>
    %251 = vector.extract_strided_slice %250 {offsets = [0, 0], sizes = [8, 384], strides = [1, 1]} : vector<8x512xf32> to vector<8x384xf32>
    %252 = arith.negf %251 : vector<8x384xf32>
    %253 = math.exp %252 : vector<8x384xf32>
    %cst_86 = arith.constant 1.000000e+00 : f32
    %254 = vector.broadcast %cst_86 : f32 to vector<8x384xf32>
    %255 = arith.addf %254, %253 : vector<8x384xf32>
    %256 = arith.divf %254, %255 : vector<8x384xf32>
    %257 = vector.extract_strided_slice %250 {offsets = [0, 384], sizes = [8, 128], strides = [1, 1]} : vector<8x512xf32> to vector<8x128xf32>
    %258 = math.tanh %257 : vector<8x128xf32>
    %259 = vector.extract_strided_slice %256 {offsets = [0, 0], sizes = [8, 128], strides = [1, 1]} : vector<8x384xf32> to vector<8x128xf32>
    %260 = vector.extract_strided_slice %256 {offsets = [0, 128], sizes = [8, 128], strides = [1, 1]} : vector<8x384xf32> to vector<8x128xf32>
    %261 = vector.extract_strided_slice %256 {offsets = [0, 256], sizes = [8, 128], strides = [1, 1]} : vector<8x384xf32> to vector<8x128xf32>
    %262 = arith.mulf %260, %238 : vector<8x128xf32>
    %263 = arith.mulf %259, %258 : vector<8x128xf32>
    %264 = arith.addf %262, %263 : vector<8x128xf32>
    %265 = math.tanh %264 : vector<8x128xf32>
    %266 = arith.mulf %261, %265 : vector<8x128xf32>
    %c8_i32_87 = arith.constant 8 : i32
    %267 = arith.muli %arg0, %c8_i32_87 : i32
    %268 = arith.addi %267, %c7_i32 : i32
    %c12_i32_88 = arith.constant 12 : i32
    %269 = arith.cmpi slt, %268, %c12_i32_88 : i32
    %270 = arith.select %269, %266, %237 : vector<8x128xf32>
    %271 = arith.select %269, %264, %238 : vector<8x128xf32>
    %272 = arith.index_cast %c7_i32 : i32 to index
    %c0_89 = arith.constant 0 : index
    %c0_90 = arith.constant 0 : index
    %273 = vector.load %arg7[%272, %c0_89, %c0_90] : memref<8x8x128xf32, #tpu.memory_space<vmem>>, vector<1x8x128xf32>
    %274 = vector.shape_cast %273 : vector<1x8x128xf32> to vector<8x128xf32>
    %275 = vector.shape_cast %270 : vector<8x128xf32> to vector<1x8x128xf32>
    tpu.vector_store %arg7[%272, %c0_89, %c0_90], %275 {strides = array<i32>} : memref<8x8x128xf32, #tpu.memory_space<vmem>>, vector<1x8x128xf32>,
    %c8_i32_91 = arith.constant 8 : i32
    %c0_92 = arith.constant 0 : index
    %c0_93 = arith.constant 0 : index
    %276 = vector.load %arg11[%c0_92, %c0_93] : memref<8x128xf32, #tpu.memory_space<vmem>>, vector<8x128xf32>
    tpu.vector_store %arg11[%c0_92, %c0_93], %270 {strides = array<i32>} : memref<8x128xf32, #tpu.memory_space<vmem>>, vector<8x128xf32>,
    %c0_94 = arith.constant 0 : index
    %c0_95 = arith.constant 0 : index
    %277 = vector.load %arg12[%c0_94, %c0_95] : memref<8x128xf32, #tpu.memory_space<vmem>>, vector<8x128xf32>
    tpu.vector_store %arg12[%c0_94, %c0_95], %271 {strides = array<i32>} : memref<8x128xf32, #tpu.memory_space<vmem>>, vector<8x128xf32>,
    %c1_i32_96 = arith.constant 1 : i32
    %278 = arith.cmpi eq, %arg0, %c1_i32_96 : i32
    %279 = arith.extui %278 : i1 to i32
    %c0_i32_97 = arith.constant 0 : i32
    %280 = arith.cmpi ne, %279, %c0_i32_97 : i32
    scf.if %280 {
      %c0_98 = arith.constant 0 : index
      %c0_99 = arith.constant 0 : index
      %281 = vector.load %arg8[%c0_98, %c0_99] : memref<8x128xf32, #tpu.memory_space<vmem>>, vector<8x128xf32>
      tpu.vector_store %arg8[%c0_98, %c0_99], %270 {strides = array<i32>} : memref<8x128xf32, #tpu.memory_space<vmem>>, vector<8x128xf32>,
      %c0_100 = arith.constant 0 : index
      %c0_101 = arith.constant 0 : index
      %282 = vector.load %arg9[%c0_100, %c0_101] : memref<8x128xf32, #tpu.memory_space<vmem>>, vector<8x128xf32>
      tpu.vector_store %arg9[%c0_100, %c0_101], %271 {strides = array<i32>} : memref<8x128xf32, #tpu.memory_space<vmem>>, vector<8x128xf32>,
    } else {
    }
    return
  }
  func.func @transform_0(%arg0: i32) -> (i32, i32) {
    %c0_i32 = arith.constant 0 : i32
    %c0_i32_0 = arith.constant 0 : i32
    return %arg0, %c0_i32 : i32, i32
  }
  func.func @transform_1(%arg0: i32) -> (i32, i32) {
    %c0_i32 = arith.constant 0 : i32
    %c0_i32_0 = arith.constant 0 : i32
    %c0_i32_1 = arith.constant 0 : i32
    return %c0_i32, %c0_i32_0 : i32, i32
  }
  func.func @transform_2(%arg0: i32) -> (i32, i32) {
    %c0_i32 = arith.constant 0 : i32
    %c0_i32_0 = arith.constant 0 : i32
    %c0_i32_1 = arith.constant 0 : i32
    return %c0_i32, %c0_i32_0 : i32, i32
  }
  func.func @transform_3(%arg0: i32) -> (i32, i32) {
    %c0_i32 = arith.constant 0 : i32
    %c0_i32_0 = arith.constant 0 : i32
    %c0_i32_1 = arith.constant 0 : i32
    return %c0_i32, %c0_i32_0 : i32, i32
  }
  func.func @transform_4(%arg0: i32) -> (i32, i32) {
    %c0_i32 = arith.constant 0 : i32
    %c0_i32_0 = arith.constant 0 : i32
    %c0_i32_1 = arith.constant 0 : i32
    return %c0_i32, %c0_i32_0 : i32, i32
  }
  func.func @transform_5(%arg0: i32) -> (i32, i32) {
    %c0_i32 = arith.constant 0 : i32
    %c0_i32_0 = arith.constant 0 : i32
    %c0_i32_1 = arith.constant 0 : i32
    return %c0_i32, %c0_i32_0 : i32, i32
  }
  func.func @transform_6(%arg0: i32) -> (i32, i32, i32) {
    %c0_i32 = arith.constant 0 : i32
    %c0_i32_0 = arith.constant 0 : i32
    %c0_i32_1 = arith.constant 0 : i32
    return %arg0, %c0_i32, %c0_i32_0 : i32, i32, i32
  }
  func.func @transform_7(%arg0: i32) -> (i32, i32) {
    %c0_i32 = arith.constant 0 : i32
    %c0_i32_0 = arith.constant 0 : i32
    %c0_i32_1 = arith.constant 0 : i32
    return %c0_i32, %c0_i32_0 : i32, i32
  }
  func.func @transform_8(%arg0: i32) -> (i32, i32) {
    %c0_i32 = arith.constant 0 : i32
    %c0_i32_0 = arith.constant 0 : i32
    %c0_i32_1 = arith.constant 0 : i32
    return %c0_i32, %c0_i32_0 : i32, i32
  }
}

</mosaic_0001>

<bundles_post_ra>
// kernel: tpu_custom_call.1
= control target key start
LH: loop header
LB: loop body
LE: loop exit
PB: predicated region body
PF: predicated region fallthrough
CT: control target
= control target key end

     0   :  { %s5452_s0 = inlined_call_operand.hbm [shape: bf16[128,128], index: 0, kind: input, shape index: {}]   ;;  %s5453_s1 = inlined_call_operand.hbm [shape: bf16[128,512], index: 1, kind: input, shape index: {}]   ;;  %s5454_s2 = inlined_call_operand.hbm [shape: bf16[128,512], index: 2, kind: input, shape index: {}]   ;;  %s5455_s3 = inlined_call_operand.hbm [shape: f32[1,512], index: 3, kind: input, shape index: {}]   ;;  %s5456_s4 = inlined_call_operand.hbm [shape: f32[8,128], index: 4, kind: input, shape index: {}]   ;;  %s5457_s5 = inlined_call_operand.vmem [shape: f32[8,128], index: 5, kind: input, shape index: {}]   ;;  %s5458_s6 = inlined_call_operand.hbm [shape: f32[16,8,128], index: 6, kind: output, shape index: {0}]   ;;  %s5459_s7 = inlined_call_operand.hbm [shape: f32[8,128], index: 7, kind: output, shape index: {1}]   ;;  %s5460_s8 = inlined_call_operand.hbm [shape: f32[8,128], index: 8, kind: output, shape index: {2}]  }
   0x1   :  { %5467 = sst [smem:[#allocation43_spill]] %s5453_s1 }
   0x2   :  { %5468 = sst [smem:[#allocation44_spill]] %s5454_s2 }
   0x3   :  { %14 = vsyncpa [#allocation6], 0 }
   0x4   :  { %16 = vsyncpa [#allocation6 + $0x1], 0 }
   0x5   :  { %17 = vsyncpa [#allocation9], 0 }
   0x6   :  { %18 = vsyncpa [#allocation12], 0 }
   0x7   :  { %19 = vsyncpa [#allocation7], 0 }
   0x8   :  { %21 = vsyncpa [#allocation7 + $0x1], 0 }
   0x9   :  { %22 = vsyncpa [#allocation16], 0  ;;  %s4601_s27 = smov 0   ;;  %s4603_s28 = smov 0  }
   0xa   :  { %s4605_s29 = smov 0   ;;  %s4607_s30 = smov 0  }
   0xb LB: > { %s4622_s9 = sadd.s32 4294967295, %s4539_s30   ;;  %s3545_s10 = sadd.s32 4294967294, %s4539_s30   ;;  %s4539_s30 = sphi %s4607_s30, %s5538_s30   ;;  %s4535_s29 = sphi %s4605_s29, %s5537_s29   ;;  %s4531_s28 = sphi %s4603_s28, %s5536_s28   ;;  %s4527_s27 = sphi %s4601_s27, %s5535_s27  }
   0xc   : > { %p48_p0 = scmp.ne.s32.totalorder %s4531_s28, %s4527_s27  ;;  %p5461_p1 = scmp.eq.s32.totalorder %s4622_s9, 0 }
   0xd   : > { %p183_p3 = scmp.eq.s32.totalorder %s3545_s10, 1  ;;  %p3546_p5 = scmp.ge.s32.totalorder %s4539_s30, 1 }
   0xe   : > { %p4631_p4 = por %p5461_p1, %p48_p0  ;;  %p232_p7 = scmp.lt.s32.totalorder %s4539_s30, 3 }
   0xf   : > { %p4636_p6 = por %p183_p3, %p48_p0  ;;  %s4541_s14 = smov [#allocation8]  }
  0x10   : > { %s5469_s11 = scalar_select %p4631_p4, 1, 0 }
  0x11   : > { %s5470_s12 = scalar_select %p4636_p6, 1, 0 }
  0x12   : > { %p4642_p9 = pnand %p3546_p5, %p232_p7  ;;  %s244_s15 = sshll.u32 %s4541_s14, 4  ;;  %s245_s15 = int_to_ptr.vmem [resolvable:$true] %s244_s15 }
  0x13   : > { %s4542_s17 = smov [#allocation11]   ;;  %s4543_s19 = smov [#allocation10]  }
  0x14   : > { %s5471_s13 = scalar_select %p4642_p9, 1, 0 }
  0x15   : > { %p3927_p10 = pneg %p4642_p9  ;;  %s271_s18 = sshll.u32 %s4542_s17, 4  ;;  %s272_s18 = int_to_ptr.vmem [resolvable:$true] %s271_s18 }
  0x16   : > { %s257_s20 = sshll.u32 %s4543_s19, 4  ;;  %s4294_s21 = scalar_lea.vmem %s245_s15, 4096  ;;  %s258_s20 = int_to_ptr.vmem [resolvable:$true] %s257_s20 }
  0x17   : > { %p4651_p12 = pnand %p3927_p10, %p5461_p1  ;;  %p4295_p0 = scmp.ne.s32.totalorder %s245_s15, %s4294_s21 }
  0x18   : > { %p4302_p7 = scmp.lt.s32.totalorder %s245_s15, %s245_s15  ;;  %p4303_p10 = scmp.lt.s32.totalorder %s4294_s21, %s4294_s21 }
  0x19   : > { %p4285_p13 = pneg %p4651_p12 }
  0x1a   : > { %p4304_p11 = por %p4303_p10, %p4302_p7 }
  0x1b   : > { %p4297_p3 = pnand %p4295_p0, %p4285_p13 }
  0x1d   : > { %p4298_p5 = pneg %p4297_p3 }
  0x1f   : > { %p4305_p8 = pnand %p4304_p11, %p4298_p5 }
  0x21   : > { %4308 = shalt.err (!%p4305_p8)
}
  0x22   : > { %s4544_s22 = smov 256   ;;  %s4545_s23 = smov 16  }
  0x23   : > { %s5473_s1 = sld [smem:[#allocation43_spill]]  ;;  %s4320_s26 = scalar_lea.vmem %s272_s18, 64 }
  0x24   : > { %p4321_p1 = scmp.ne.s32.totalorder %s272_s18, %s4320_s26  ;;  %p4328_p2 = scmp.lt.s32.totalorder %s272_s18, %s272_s18 }
  0x25   : > { %p4329_p6 = scmp.lt.s32.totalorder %s4320_s26, %s4320_s26 }
  0x26   : > { %p4323_p0 = pnand %p4321_p1, %p4285_p13 }
  0x27   : > { %p4330_p7 = por %p4329_p6, %p4328_p2 }
  0x28   : > { %p4324_p3 = pneg %p4323_p0 }
  0x29   : > { %3930 = dma.hbm_to_vmem [thread:$0]  (!%p4651_p12), %s5473_s1, 4096, %s245_s15, [#allocation9], %s4544_s22, %s4544_s22, %s4545_s23  }
  0x2a   : > { %p4331_p11 = pnand %p4330_p7, %p4324_p3 }
  0x2c   : > { %4334 = shalt.err (!%p4331_p11)
}
  0x2d   : > { %3936 = dma.hbm_to_vmem [thread:$0]  (!%p4651_p12), %s5455_s3, 64, %s272_s18, [#allocation12]  }
  0x2e   : > { %s4346_s15 = scalar_lea.vmem %s258_s20, 4096  ;;  %p4354_p10 = scmp.lt.s32.totalorder %s258_s20, %s258_s20 }
  0x2f   : > { %p4347_p8 = scmp.ne.s32.totalorder %s258_s20, %s4346_s15  ;;  %p4355_p0 = scmp.lt.s32.totalorder %s4346_s15, %s4346_s15 }
  0x31   : > { %p4349_p5 = pnand %p4347_p8, %p4285_p13  ;;  %p4356_p4 = por %p4355_p0, %p4354_p10 }
  0x33   : > { %p4350_p1 = pneg %p4349_p5 }
  0x35   : > { %p4357_p2 = pnand %p4356_p4, %p4350_p1 }
  0x37   : > { %4360 = shalt.err (!%p4357_p2)
}
  0x38   : > { %s5474_s2 = sld [smem:[#allocation44_spill]]  ;;  %s4546_s18 = smov [#allocation13]  }
  0x39   : > { %s282_s21 = sshll.u32 %s4546_s18, 4  ;;  %s283_s21 = int_to_ptr.vmem [resolvable:$true] %s282_s21 }
  0x3a   : > { %s4372_s24 = scalar_lea.vmem %s283_s21, 128  ;;  %p4380_p11 = scmp.lt.s32.totalorder %s283_s21, %s283_s21 }
  0x3b   : > { %p4373_p6 = scmp.ne.s32.totalorder %s283_s21, %s4372_s24  ;;  %p4381_p8 = scmp.lt.s32.totalorder %s4372_s24, %s4372_s24 }
  0x3d   : > { %p4375_p3 = pnand %p4373_p6, %p4285_p13  ;;  %p4382_p4 = por %p4381_p8, %p4380_p11 }
  0x3e   : > { %3933 = dma.hbm_to_vmem [thread:$0]  (!%p4651_p12), %s5474_s2, 4096, %s258_s20, [#allocation9], %s4544_s22, %s4544_s22, %s4545_s23  }
  0x3f   : > { %p4376_p7 = pneg %p4375_p3 }
  0x41   : > { %p4383_p5 = pnand %p4382_p4, %p4376_p7 }
  0x43   : > { %4386 = shalt.err (!%p4383_p5)
}
  0x44   : > { %3939 = dma.hbm_to_vmem [thread:$0]  (!%p4651_p12), %s5456_s4, 128, %s283_s21, [#allocation12]  }
  0x45   : > { %s4690_s20 = sadd.s32 1, %s4539_s30   ;;  %s35_s22 = sadd.s32 1, %s4535_s29 }
  0x46   : > { %s32_s16 = ssub.s32 %s4539_s30, %s4690_s20  ;;  %p42_p13 = scmp.ne.s32.totalorder %s4535_s29, %s4531_s28 }
  0x47   : > { %p33_p1 = scmp.eq.s32.totalorder %s32_s16, 0  ;;  %p43_p10 = scmp.eq.s32.totalorder %s4539_s30, 0 }
  0x48   : > { %p5475_p0 = scmp.eq.s32.totalorder %s4622_s9, 1  ;;  %p3952_p6 = scmp.lt.s32.totalorder %s4539_s30, 2 }
  0x49   : > { %s4706_s10 = scalar_select %p33_p1, %s4535_s29, %s35_s22  }
  0x4a   : > { %p4700_p2 = por %p5475_p0, %p42_p13  ;;  %p44_p3 = por %p43_p10, %p42_p13 }
  0x4b   : > { %s296_s14 = sand.u32 1, %s4535_s29   ;;  %s3897_s17 = sshll.u32 %s4539_s30, 9 }
  0x4c   : > { %s5476_s23 = scalar_select %p4700_p2, 1, 0 }
  0x4d   : > { %s3552_s15 = sshll.u32 %s296_s14, 5  ;;  %s4713_s21 = scalar_lea.hbm %s5452_s0, %s3897_s17 }
  0x4e   : > { %s300_s24 = scalar_lea.vmem [#allocation5], %s3552_s15  ;;  %p4717_p12 = pnand %p3952_p6, %p44_p3 }
  0x4f   : > { %s307_s25 = sshll.u32 %s300_s24, 4  ;;  %s4721_s22 = scalar_lea.sflag [#allocation6], %s296_s14  ;;  %s4715_s25 = int_to_ptr.vmem [resolvable:$true] %s307_s25 }
  0x50   : > { %s4387_s16 = scalar_lea.hbm %s4713_s21, 512  ;;  %p4389_p11 = pneg %p4717_p12 }
  0x51   : > { %p4388_p7 = scmp.ne.s32.totalorder %s4713_s21, %s4387_s16  ;;  %s4392_s15 = scalar_lea.hbm %s5452_s0, 1024 }
  0x52   : > { %p4393_p5 = scmp.lt.s32.totalorder %s4713_s21, %s5452_s0  ;;  %p4394_p13 = scmp.lt.s32.totalorder %s4392_s15, %s4387_s16 }
  0x53   : > { %p4390_p8 = pnand %p4389_p11, %p4388_p7 }
  0x54   : > { %p4395_p1 = por %p4394_p13, %p4393_p5 }
  0x55   : > { %p4391_p4 = pneg %p4390_p8 }
  0x57   : > { %p4396_p10 = pnand %p4395_p1, %p4391_p4 }
  0x59   : > { %4399 = shalt.err (!%p4396_p10)
}
  0x5a   : > { %s4400_s14 = scalar_lea.vmem %s4715_s25, 512  ;;  %s4547_s1 = smov [#allocation5]  }
  0x5b   : > { %p4401_p0 = scmp.ne.s32.totalorder %s4715_s25, %s4400_s14  ;;  %s4405_s2 = sshll.u32 %s4547_s1, 4  ;;  %s4406_s2 = int_to_ptr.vmem [resolvable:$false] %s4405_s2 }
  0x5c   : > { %s4407_s17 = scalar_lea.vmem %s4406_s2, 1024  ;;  %p4408_p7 = scmp.lt.s32.totalorder %s4715_s25, %s4406_s2 }
  0x5d   : > { %p4403_p6 = pnand %p4401_p0, %p4389_p11  ;;  %p4409_p8 = scmp.lt.s32.totalorder %s4407_s17, %s4400_s14 }
  0x5f   : > { %p4404_p3 = pneg %p4403_p6  ;;  %p4410_p2 = por %p4409_p8, %p4408_p7 }
  0x61   : > { %p4411_p9 = pnand %p4410_p2, %p4404_p3 }
  0x63   : > { %4414 = shalt.err (!%p4411_p9)
}
  0x64   : > { %s4548_s16 = smov 64   ;;  %s4549_s19 = smov 4  }
  0x65   : > { %3943 = dma.hbm_to_vmem [thread:$0]  (!%p4717_p12), %s4713_s21, 512, %s4715_s25, %s4721_s22, %s4548_s16, %s4548_s16, %s4549_s19  }
  0x66   : > { %p5478_p11 = scmp.ne.s32.totalorder %s5471_s13, 0 }
  0x68   : > { %319 = sbr.rel (%p5478_p11) target bundleno = 2267 (0x8db), region = 44 }
  0x6d   : > { %s4745_s1 = sand.u32 1, %s4531_s28   ;;  %p5479_p9 = scmp.ne.s32.totalorder %s5469_s11, 0 }
  0x6e   : > { %s3556_s2 = sshll.u32 %s4745_s1, 5  ;;  %s322_s15 = scalar_lea.sflag [#allocation6], %s4745_s1 }
  0x6f   : > { %s4749_s18 = scalar_lea.vmem [#allocation5], %s3556_s2 }
  0x70   : > { %4506 = dma.done.wait (%p5479_p9), %s322_s15, 512  }
  0x71   : > { %4508 = vsyncadd (%p5479_p9), %s322_s15, 4294966784  ;;  %p5480_p2 = scmp.eq.s32.totalorder %s4622_s9, 0 }
  0x73   : > { %4510 = dma.done.wait (%p5480_p2), [#allocation9], 8192   ;;  %p5481_p12 = pmov %p5480_p2 }
  0x74   : > { %p5482_p4 = pmov %p5480_p2 }
  0x75   : > { %4512 = vsyncadd (%p5481_p12), [#allocation9], 4294959104 }
  0x76   : > { %4514 = dma.done.wait (%p5482_p4), [#allocation12], 192   ;;  %p5483_p5 = pmov %p5480_p2 }
  0x77   : > { %s3561_s13 = sshll.u32 %s4745_s1, 6  ;;  %p5484_p13 = scmp.ne.s32.totalorder %s4622_s9, 0 }
  0x78   : > { %4516 = vsyncadd (%p5483_p5), [#allocation12], 4294967104  ;;  %s4764_s21 = scalar_lea.vmem [#allocation14], %s3561_s13 }
  0x79   : > { %380 = sbr.rel (%p5484_p13) target bundleno = 128 (0x80), region = 68 }
  0x7e   : > { %v381_v0 = vld [vmem:[#allocation13] sm:$0xff]  ;;  %v383_v1 = vld [vmem:[%s5457_s5] sm:$0xff] }
  0x7f   : > { %382 = vst [vmem:[#allocation3] sm:$0xff] %v381_v0  ;;  %384 = vst [vmem:[#allocation4] sm:$0xff] %v383_v1 }
  0x80 PF: > { %v4007_v2 = vld [vmem:[#allocation8 + $0xe4] ss:$16 sps:$4 sm:$0xff]   ;;  %v4009_v3 = vld [vmem:[#allocation8 + $0xec] ss:$16 sps:$4 sm:$0xff]   ;;  %v5465_v4 = vmov 0   ;;  %s5010_s26 = sshll.u32 %s4622_s9, 3 }
  0x81   : > { %663 = vmatprep.mubr.bf16.mxu0 %v5465_v4  ;;  %736 = vmatprep.mubr.bf16.mxu1 %v5465_v4  ;;  %v4011_v5 = vld [vmem:[#allocation8 + $0xe0] ss:$16 sps:$4 sm:$0xff]   ;;  %v4012_v6 = vld [vmem:[#allocation8 + $0xe8] ss:$16 sps:$4 sm:$0xff]   ;;  %v4013_v7 = vld [vmem:[#allocation8 + $0xc4] ss:$16 sps:$4 sm:$0xff]  }
  0x82   : > { %631 = vmatprep.subr.bf16.mxu0 %v4007_v2  ;;  %704 = vmatprep.subr.bf16.mxu1 %v4009_v3  ;;  %v4015_v8 = vld [vmem:[#allocation8 + $0xcc] ss:$16 sps:$4 sm:$0xff]   ;;  %v4017_v9 = vld [vmem:[#allocation8 + $0xc0] ss:$16 sps:$4 sm:$0xff]   ;;  %v4018_v10 = vld [vmem:[#allocation8 + $0xc8] ss:$16 sps:$4 sm:$0xff]  }
  0x83   : > { %632 = vmatpush1.bf16.msra.mxu0 %v4011_v5  ;;  %705 = vmatpush1.bf16.msra.mxu1 %v4012_v6  ;;  %v4019_v11 = vld [vmem:[#allocation8 + $0xa4] ss:$16 sps:$4 sm:$0xff]   ;;  %v4021_v12 = vld [vmem:[#allocation8 + $0xac] ss:$16 sps:$4 sm:$0xff]   ;;  %v4023_v13 = vld [vmem:[#allocation8 + $0xa0] ss:$16 sps:$4 sm:$0xff]  }
  0x84   : > { %633 = vmatprep.subr.bf16.mxu0 %v4013_v7  ;;  %706 = vmatprep.subr.bf16.mxu1 %v4015_v8  ;;  %v4024_v14 = vld [vmem:[#allocation8 + $0xa8] ss:$16 sps:$4 sm:$0xff]   ;;  %v4025_v15 = vld [vmem:[#allocation8 + $0x84] ss:$16 sps:$4 sm:$0xff]   ;;  %v4027_v16 = vld [vmem:[#allocation8 + $0x8c] ss:$16 sps:$4 sm:$0xff]  }
  0x85   : > { %v4029_v17 = vld [vmem:[#allocation8 + $0x80] ss:$16 sps:$4 sm:$0xff]   ;;  %v4030_v18 = vld [vmem:[#allocation8 + $0x88] ss:$16 sps:$4 sm:$0xff]   ;;  %v4031_v19 = vld [vmem:[#allocation8 + $0x64] ss:$16 sps:$4 sm:$0xff]  }
  0x86   : > { %v4033_v20 = vld [vmem:[#allocation8 + $0x6c] ss:$16 sps:$4 sm:$0xff]   ;;  %v4035_v21 = vld [vmem:[#allocation8 + $0x60] ss:$16 sps:$4 sm:$0xff]   ;;  %v4036_v22 = vld [vmem:[#allocation8 + $0x68] ss:$16 sps:$4 sm:$0xff]  }
  0x87   : > { %634 = vmatpush1.bf16.msra.mxu0 %v4017_v9  ;;  %707 = vmatpush1.bf16.msra.mxu1 %v4018_v10  ;;  %v4037_v23 = vld [vmem:[#allocation8 + $0x44] ss:$16 sps:$4 sm:$0xff]   ;;  %v4039_v24 = vld [vmem:[#allocation8 + $0x4c] ss:$16 sps:$4 sm:$0xff]   ;;  %v4041_v25 = vld [vmem:[#allocation8 + $0x40] ss:$16 sps:$4 sm:$0xff]   ;;  %v427_v10 = vlaneseq }
  0x88   : > { %635 = vmatprep.subr.bf16.mxu0 %v4019_v11  ;;  %708 = vmatprep.subr.bf16.mxu1 %v4021_v12  ;;  %v4042_v26 = vld [vmem:[#allocation8 + $0x48] ss:$16 sps:$4 sm:$0xff]   ;;  %v4043_v27 = vld [vmem:[#allocation8 + $0x24] ss:$16 sps:$4 sm:$0xff]   ;;  %v4045_v28 = vld [vmem:[#allocation8 + $0x2c] ss:$16 sps:$4 sm:$0xff]  }
  0x89   : > { %v4047_v29 = vld [vmem:[#allocation8 + $0x20] ss:$16 sps:$4 sm:$0xff]   ;;  %v4048_v30 = vld [vmem:[#allocation8 + $0x28] ss:$16 sps:$4 sm:$0xff]   ;;  %v4049_v31 = vld [vmem:[#allocation8 + $0x4] ss:$16 sps:$4 sm:$0xff]  }
  0x8a   : > { %v4051_v32 = vld [vmem:[#allocation8 + $0xc] ss:$16 sps:$4 sm:$0xff]   ;;  %v4053_v33 = vld [vmem:[#allocation8] ss:$16 sps:$4 sm:$0xff]   ;;  %v4054_v34 = vld [vmem:[#allocation8 + $0x8] ss:$16 sps:$4 sm:$0xff]  }
  0x8b   : > { %636 = vmatpush1.bf16.msra.mxu0 %v4023_v13  ;;  %709 = vmatpush1.bf16.msra.mxu1 %v4024_v14  ;;  %v4773_v35 = vld [vmem:[#allocation10 + $0xe4] ss:$16 sps:$4 sm:$0xff]   ;;  %v4775_v36 = vld [vmem:[#allocation10 + $0xec] ss:$16 sps:$4 sm:$0xff]   ;;  %v4778_v38 = vld [vmem:[#allocation10 + $0xe0] ss:$16 sps:$4 sm:$0xff]  }
  0x8c   : > { %637 = vmatprep.subr.bf16.mxu0 %v4025_v15  ;;  %710 = vmatprep.subr.bf16.mxu1 %v4027_v16  ;;  %v4055_v37 = vld [vmem:[%s4749_s18] sm:$0xff]   ;;  %v4780_v39 = vld [vmem:[#allocation10 + $0xe8] ss:$16 sps:$4 sm:$0xff]   ;;  %v4786_v41 = vld [vmem:[#allocation10 + $0xcc] ss:$16 sps:$4 sm:$0xff]   ;;  %v428_v11 = vshrl.u32 %v427_v10, 7 }
  0x8d   : > { %v4784_v40 = vld [vmem:[#allocation10 + $0xc4] ss:$16 sps:$4 sm:$0xff]   ;;  %v4788_v42 = vld [vmem:[#allocation10 + $0xc0] ss:$16 sps:$4 sm:$0xff]   ;;  %v4792_v43 = vld [vmem:[#allocation10 + $0xc8] ss:$16 sps:$4 sm:$0xff]  }
  0x8e   : > { %v4796_v44 = vld [vmem:[#allocation10 + $0xa4] ss:$16 sps:$4 sm:$0xff]   ;;  %v4798_v45 = vld [vmem:[#allocation10 + $0xac] ss:$16 sps:$4 sm:$0xff]   ;;  %v4803_v47 = vld [vmem:[#allocation10 + $0xa0] ss:$16 sps:$4 sm:$0xff]  }
  0x8f   : > { %638 = vmatpush1.bf16.msra.mxu0 %v4029_v17  ;;  %711 = vmatpush1.bf16.msra.mxu1 %v4030_v18  ;;  %v4068_v46 = vld [vmem:[%s4749_s18 + $0x8] sm:$0xff]   ;;  %v4809_v49 = vld [vmem:[#allocation10 + $0x84] ss:$16 sps:$4 sm:$0xff]   ;;  %v4815_v51 = vld [vmem:[#allocation10 + $0x80] ss:$16 sps:$4 sm:$0xff]   ;;  %v437_v12 = vsub.s32 2, %v428_v11 }
  0x90   : > { %639 = vmatprep.subr.bf16.mxu0 %v4031_v19  ;;  %712 = vmatprep.subr.bf16.mxu1 %v4033_v20  ;;  %v4805_v48 = vld [vmem:[#allocation10 + $0xa8] ss:$16 sps:$4 sm:$0xff]   ;;  %v4813_v50 = vld [vmem:[#allocation10 + $0x8c] ss:$16 sps:$4 sm:$0xff]   ;;  %v4821_v53 = vld [vmem:[#allocation10 + $0x64] ss:$16 sps:$4 sm:$0xff]  }
  0x91   : > { %v4817_v52 = vld [vmem:[#allocation10 + $0x88] ss:$16 sps:$4 sm:$0xff]   ;;  %v4825_v54 = vld [vmem:[#allocation10 + $0x6c] ss:$16 sps:$4 sm:$0xff]   ;;  %v4081_v55 = vld [vmem:[%s4749_s18 + $0x10] sm:$0xff]   ;;  %v429_v13 = vsub.s32 0, %v428_v11 }
  0x92   : > { %v4830_v56 = vld [vmem:[#allocation10 + $0x60] ss:$16 sps:$4 sm:$0xff]   ;;  %v4832_v57 = vld [vmem:[#allocation10 + $0x68] ss:$16 sps:$4 sm:$0xff]   ;;  %v4834_v58 = vld [vmem:[#allocation10 + $0x44] ss:$16 sps:$4 sm:$0xff]  }
  0x93   : > { %640 = vmatpush1.bf16.msra.mxu0 %v4035_v21  ;;  %713 = vmatpush1.bf16.msra.mxu1 %v4036_v22  ;;  %v4836_v59 = vld [vmem:[#allocation10 + $0x4c] ss:$16 sps:$4 sm:$0xff]   ;;  %v4842_v60 = vld [vmem:[#allocation10 + $0x40] ss:$16 sps:$4 sm:$0xff]   ;;  %v4844_v61 = vld [vmem:[#allocation10 + $0x48] ss:$16 sps:$4 sm:$0xff]  }
  0x94   : > { %641 = vmatprep.subr.bf16.mxu0 %v4037_v23  ;;  %714 = vmatprep.subr.bf16.mxu1 %v4039_v24  ;;  %v4846_v62 = vld [vmem:[#allocation10 + $0x24] ss:$16 sps:$4 sm:$0xff]   ;;  %v4848_v63 = vld [vmem:[#allocation10 + $0x2c] ss:$16 sps:$4 sm:$0xff]   ;;  %v4857_v1 = vld [vmem:[#allocation10 + $0x20] ss:$16 sps:$4 sm:$0xff]  }
  0x95   : > { %v4094_v0 = vld [vmem:[%s4749_s18 + $0x18] sm:$0xff]   ;;  %v4861_v3 = vld [vmem:[#allocation10 + $0x4] ss:$16 sps:$4 sm:$0xff]   ;;  %v4871_v6 = vld [vmem:[#allocation10] ss:$16 sps:$4 sm:$0xff]   ;;  %v441_v14 = vsub.s32 3, %v428_v11 }
  0x96   : > { %v4859_v2 = vld [vmem:[#allocation10 + $0x28] ss:$16 sps:$4 sm:$0xff]   ;;  %v4863_v5 = vld [vmem:[#allocation10 + $0xc] ss:$16 sps:$4 sm:$0xff]   ;;  %v4875_v8 = vld [vmem:[#allocation3] sm:$0xff]  ;;  %v433_v19 = vsub.s32 1, %v428_v11 }
  0x97   : > { %642 = vmatpush1.bf16.msra.mxu0 %v4041_v25  ;;  %715 = vmatpush1.bf16.msra.mxu1 %v4042_v26  ;;  %v4873_v7 = vld [vmem:[#allocation10 + $0x8] ss:$16 sps:$4 sm:$0xff]   ;;  %v818_v9 = vpack.c.bf16 %v4875_v8, %v4875_v8  ;;  %v425_v15 = vld [vmem:[#allocation11] sm:$0xf]  ;;  %p1122_p1 = scmp.lt.s32.totalorder %s5010_s26, 12  ;;  %s1439_s24 = sadd.s32 1, %s5010_s26 }
  0x98   : > { %643 = vmatprep.subr.bf16.mxu0 %v4043_v27  ;;  %716 = vmatprep.subr.bf16.mxu1 %v4045_v28  ;;  %v4925_v18 = vrot.slane %v425_v15, %v437_v12  ;;  %v430_v22 = vrot.slane %v425_v15, %v429_v13  ;;  %v4931_v23 = vrot.slane %v425_v15, %v441_v14  ;;  %p1440_p10 = scmp.lt.s32.totalorder %s1439_s24, 12  ;;  %s1758_s17 = sadd.s32 2, %s5010_s26 }
  0x99   : > { %v434_v26 = vrot.slane %v425_v15, %v433_v19  ;;  %s1123_s22 = scalar_select %p1122_p1, 1, 0 }
  0x9a   : > { %s1441_s14 = scalar_select %p1440_p10, 1, 0 }
  0x9b   : > { %644 = vmatpush1.bf16.msra.mxu0 %v4047_v29  ;;  %717 = vmatpush1.bf16.msra.mxu1 %v4048_v30  ;;  %p1759_p0 = scmp.lt.s32.totalorder %s1758_s17, 12  ;;  %s2077_s19 = sadd.s32 3, %s5010_s26 }
  0x9c   : > { %645 = vmatprep.subr.bf16.mxu0 %v4049_v31  ;;  %718 = vmatprep.subr.bf16.mxu1 %v4051_v32  ;;  %p2078_p6 = scmp.lt.s32.totalorder %s2077_s19, 12  ;;  %s2396_s15 = sadd.s32 4, %s5010_s26 }
  0x9d   : > { %s1760_s16 = scalar_select %p1759_p0, 1, 0 }
  0x9e   : > { %s2079_s2 = scalar_select %p2078_p6, 1, 0 }
  0x9f   : > { %646 = vmatpush1.bf16.msra.mxu0 %v4053_v33  ;;  %719 = vmatpush1.bf16.msra.mxu1 %v4054_v34  ;;  %p2397_p3 = scmp.lt.s32.totalorder %s2396_s15, 12  ;;  %s2715_s13 = sadd.s32 5, %s5010_s26 }
  0xa0   : > { %1011 = vmatprep.subr.bf16.mxu0 %v4773_v35  ;;  %1052 = vmatprep.subr.bf16.mxu1 %v4775_v36  ;;  %p2716_p7 = scmp.lt.s32.totalorder %s2715_s13, 12  ;;  %s3034_s25 = sadd.s32 6, %s5010_s26 }
  0xa1   : > { %s2398_s18 = scalar_select %p2397_p3, 1, 0 }
  0xa2   : > { %664 = vmatmul.mubr.bf16.vlgmr.msra.gmra.mxu0 %v4055_v37  ;;  %737 = vmatmul.mubr.bf16.vlgmr.msra.gmra.mxu1 %v4055_v37  ;;  %s2717_s11 = scalar_select %p2716_p7, 1, 0 }
  0xa3   : > { %1012 = vmatpush1.bf16.msra.mxu0 %v4778_v38  ;;  %1053 = vmatpush1.bf16.msra.mxu1 %v4780_v39  ;;  %p3035_p8 = scmp.lt.s32.totalorder %s3034_s25, 12  ;;  %s3353_s24 = sadd.s32 7, %s5010_s26 }
  0xa4   : > { %1013 = vmatprep.subr.bf16.mxu0 %v4784_v40  ;;  %1054 = vmatprep.subr.bf16.mxu1 %v4786_v41  ;;  %p3354_p11 = scmp.lt.s32.totalorder %s3353_s24, 12  ;;  %p3887_p9 = scmp.ne.s32.totalorder %s4622_s9, 1 }
  0xa5   : > { %673 = vmatprep.mubr.bf16.mxu0 %v5465_v4  ;;  %746 = vmatprep.mubr.bf16.mxu1 %v5465_v4 }
  0xa7   : > { %1014 = vmatpush1.bf16.msra.mxu0 %v4788_v42  ;;  %1055 = vmatpush1.bf16.msra.mxu1 %v4792_v43 }
  0xa8   : > { %1015 = vmatprep.subr.bf16.mxu0 %v4796_v44  ;;  %1056 = vmatprep.subr.bf16.mxu1 %v4798_v45 }
  0xaa   : > { %674 = vmatmul.mubr.bf16.gmra.mxu0 %v4068_v46  ;;  %747 = vmatmul.mubr.bf16.gmra.mxu1 %v4068_v46 }
  0xab   : > { %1016 = vmatpush1.bf16.msra.mxu0 %v4803_v47  ;;  %1057 = vmatpush1.bf16.msra.mxu1 %v4805_v48 }
  0xac   : > { %1017 = vmatprep.subr.bf16.mxu0 %v4809_v49  ;;  %1058 = vmatprep.subr.bf16.mxu1 %v4813_v50 }
  0xad   : > { %683 = vmatprep.mubr.bf16.mxu0 %v5465_v4  ;;  %756 = vmatprep.mubr.bf16.mxu1 %v5465_v4 }
  0xaf   : > { %1018 = vmatpush1.bf16.msra.mxu0 %v4815_v51  ;;  %1059 = vmatpush1.bf16.msra.mxu1 %v4817_v52 }
  0xb0   : > { %1019 = vmatprep.subr.bf16.mxu0 %v4821_v53  ;;  %1060 = vmatprep.subr.bf16.mxu1 %v4825_v54 }
  0xb2   : > { %684 = vmatmul.mubr.bf16.gmra.mxu0 %v4081_v55  ;;  %757 = vmatmul.mubr.bf16.gmra.mxu1 %v4081_v55 }
  0xb3   : > { %1020 = vmatpush1.bf16.msra.mxu0 %v4830_v56  ;;  %1061 = vmatpush1.bf16.msra.mxu1 %v4832_v57 }
  0xb4   : > { %1021 = vmatprep.subr.bf16.mxu0 %v4834_v58  ;;  %1062 = vmatprep.subr.bf16.mxu1 %v4836_v59 }
  0xb5   : > { %693 = vmatprep.mubr.bf16.mxu0 %v5465_v4  ;;  %766 = vmatprep.mubr.bf16.mxu1 %v5465_v4 }
  0xb7   : > { %1022 = vmatpush1.bf16.msra.mxu0 %v4842_v60  ;;  %1063 = vmatpush1.bf16.msra.mxu1 %v4844_v61 }
  0xb8   : > { %1023 = vmatprep.subr.bf16.mxu0 %v4846_v62  ;;  %1064 = vmatprep.subr.bf16.mxu1 %v4848_v63 }
  0xba   : > { %694 = vmatmul.mubr.bf16.gmra.mxu0 %v4094_v0  ;;  %767 = vmatmul.mubr.bf16.gmra.mxu1 %v4094_v0 }
  0xbb   : > { %1024 = vmatpush1.bf16.msra.mxu0 %v4857_v1  ;;  %1065 = vmatpush1.bf16.msra.mxu1 %v4859_v2 }
  0xbc   : > { %1025 = vmatprep.subr.bf16.mxu0 %v4861_v3  ;;  %1066 = vmatprep.subr.bf16.mxu1 %v4863_v5 }
  0xbd   : > { %1043 = vmatprep.mubr.bf16.mxu0 %v5465_v4  ;;  %1084 = vmatprep.mubr.bf16.mxu1 %v5465_v4 }
  0xbf   : > { %1026 = vmatpush1.bf16.msra.mxu0 %v4871_v6  ;;  %1067 = vmatpush1.bf16.msra.mxu1 %v4873_v7 }
  0xc0   : > { %1329 = vmatprep.subr.bf16.mxu0 %v4773_v35  ;;  %1370 = vmatprep.subr.bf16.mxu1 %v4775_v36 }
  0xc2   : > { %1044 = vmatmul.mubr.bf16.vlgmr.msra.gmra.mxu0 %v818_v9  ;;  %1085 = vmatmul.mubr.bf16.vlgmr.msra.gmra.mxu1 %v818_v9 }
  0xc3   : > { %1330 = vmatpush1.bf16.msra.mxu0 %v4778_v38  ;;  %1371 = vmatpush1.bf16.msra.mxu1 %v4780_v39 }
  0xc4   : > { %1331 = vmatprep.subr.bf16.mxu0 %v4784_v40  ;;  %1372 = vmatprep.subr.bf16.mxu1 %v4786_v41 }
  0xc5   : > { %1361 = vmatprep.mubr.bf16.mxu0 %v5465_v4  ;;  %1402 = vmatprep.mubr.bf16.mxu1 %v5465_v4 }
  0xc7   : > { %1332 = vmatpush1.bf16.msra.mxu0 %v4788_v42  ;;  %1373 = vmatpush1.bf16.msra.mxu1 %v4792_v43 }
  0xc8   : > { %1333 = vmatprep.subr.bf16.mxu0 %v4796_v44  ;;  %1374 = vmatprep.subr.bf16.mxu1 %v4798_v45 }
  0xcb   : > { %1334 = vmatpush1.bf16.msra.mxu0 %v4803_v47  ;;  %1375 = vmatpush1.bf16.msra.mxu1 %v4805_v48 }
  0xcc   : > { %1335 = vmatprep.subr.bf16.mxu0 %v4809_v49  ;;  %1376 = vmatprep.subr.bf16.mxu1 %v4813_v50 }
  0xcf   : > { %1336 = vmatpush1.bf16.msra.mxu0 %v4815_v51  ;;  %1377 = vmatpush1.bf16.msra.mxu1 %v4817_v52 }
  0xd0   : > { %1337 = vmatprep.subr.bf16.mxu0 %v4821_v53  ;;  %1378 = vmatprep.subr.bf16.mxu1 %v4825_v54 }
  0xd3   : > { %1338 = vmatpush1.bf16.msra.mxu0 %v4830_v56  ;;  %1379 = vmatpush1.bf16.msra.mxu1 %v4832_v57 }
  0xd4   : > { %1339 = vmatprep.subr.bf16.mxu0 %v4834_v58  ;;  %1380 = vmatprep.subr.bf16.mxu1 %v4836_v59 }
  0xd7   : > { %1340 = vmatpush1.bf16.msra.mxu0 %v4842_v60  ;;  %1381 = vmatpush1.bf16.msra.mxu1 %v4844_v61 }
  0xd8   : > { %1341 = vmatprep.subr.bf16.mxu0 %v4846_v62  ;;  %1382 = vmatprep.subr.bf16.mxu1 %v4848_v63 }
  0xdb   : > { %1342 = vmatpush1.bf16.msra.mxu0 %v4857_v1  ;;  %1383 = vmatpush1.bf16.msra.mxu1 %v4859_v2 }
  0xdc   : > { %1343 = vmatprep.subr.bf16.mxu0 %v4861_v3  ;;  %1384 = vmatprep.subr.bf16.mxu1 %v4863_v5 }
  0xdf   : > { %1344 = vmatpush1.bf16.msra.mxu0 %v4871_v6  ;;  %1385 = vmatpush1.bf16.msra.mxu1 %v4873_v7 }
  0xe0   : > { %1648 = vmatprep.subr.bf16.mxu0 %v4773_v35  ;;  %1689 = vmatprep.subr.bf16.mxu1 %v4775_v36 }
 0x162   : > { %v4921_v16 = vpop.f32.mrf.mxu0  ;;  %v4923_v17 = vpop.f32.mrf.mxu1 }
 0x164   : > { %v4927_v20 = vpop.f32.mrf.mxu0  ;;  %v4929_v21 = vpop.f32.mrf.mxu1 }
 0x166   : > { %v669_v24 = vpop.f32.mrf.mxu0  ;;  %v742_v25 = vpop.f32.mrf.mxu1 }
 0x167   : > { %v4933_v27 = vadd.f32 %v669_v24, %v430_v22  ;;  %v4936_v28 = vadd.f32 %v742_v25, %v4925_v18 }
 0x168   : > { %v671_v29 = vpop.f32.mrf.mxu0  ;;  %v744_v30 = vpop.f32.mrf.mxu1 }
 0x169   : > { %v4938_v31 = vadd.f32 %v671_v29, %v434_v26  ;;  %v4941_v32 = vadd.f32 %v744_v30, %v4931_v23 }
 0x16a   : > { %v675_v33 = vpop.f32.mrf.mxu0  ;;  %v748_v34 = vpop.f32.mrf.mxu1 }
 0x16b   : > { %v4943_v37 = vadd.f32 %v675_v33, %v430_v22  ;;  %v4946_v46 = vadd.f32 %v748_v34, %v4925_v18 }
 0x16c   : > { %v677_v55 = vpop.f32.mrf.mxu0  ;;  %v750_v0 = vpop.f32.mrf.mxu1 }
 0x16d   : > { %5485 = vst [vmem:[#allocation23_spill] sm:$0xff] %v4946_v46  ;;  %v4948_v9 = vadd.f32 %v677_v55, %v434_v26  ;;  %v4951_v10 = vadd.f32 %v750_v0, %v4931_v23 }
 0x16e   : > { %v679_v11 = vpop.f32.mrf.mxu0  ;;  %v752_v12 = vpop.f32.mrf.mxu1 }
 0x16f   : > { %5486 = vst [vmem:[#allocation24_spill] sm:$0xff] %v4951_v10  ;;  %v4953_v13 = vadd.f32 %v679_v11, %v430_v22  ;;  %v4956_v14 = vadd.f32 %v752_v12, %v4925_v18 }
 0x170   : > { %v681_v15 = vpop.f32.mrf.mxu0  ;;  %v754_v19 = vpop.f32.mrf.mxu1 }
 0x171   : > { %5487 = vst [vmem:[#allocation25_spill] sm:$0xff] %v4953_v13  ;;  %5488 = vst [vmem:[#allocation26_spill] sm:$0xff] %v4956_v14  ;;  %v4958_v24 = vadd.f32 %v681_v15, %v434_v26  ;;  %v4961_v25 = vadd.f32 %v754_v19, %v4931_v23 }
 0x172   : > { %v685_v29 = vpop.f32.mrf.mxu0  ;;  %v758_v30 = vpop.f32.mrf.mxu1 }
 0x173   : > { %5489 = vst [vmem:[#allocation27_spill] sm:$0xff] %v4958_v24  ;;  %5490 = vst [vmem:[#allocation28_spill] sm:$0xff] %v4961_v25  ;;  %v4963_v33 = vadd.f32 %v685_v29, %v430_v22  ;;  %v4966_v34 = vadd.f32 %v758_v30, %v4925_v18 }
 0x174   : > { %v687_v55 = vpop.f32.mrf.mxu0  ;;  %v760_v0 = vpop.f32.mrf.mxu1 }
 0x175   : > { %5491 = vst [vmem:[#allocation29_spill] sm:$0xff] %v4963_v33  ;;  %5492 = vst [vmem:[#allocation30_spill] sm:$0xff] %v4966_v34  ;;  %v4968_v11 = vadd.f32 %v687_v55, %v434_v26  ;;  %v4971_v12 = vadd.f32 %v760_v0, %v4931_v23 }
 0x176   : > { %v689_v4 = vpop.f32.mrf.mxu0  ;;  %v762_v15 = vpop.f32.mrf.mxu1 }
 0x177   : > { %5493 = vst [vmem:[#allocation31_spill] sm:$0xff] %v4968_v11  ;;  %5494 = vst [vmem:[#allocation32_spill] sm:$0xff] %v4971_v12  ;;  %v4973_v14 = vadd.f32 %v689_v4, %v430_v22  ;;  %v4976_v19 = vadd.f32 %v762_v15, %v4925_v18 }
 0x178   : > { %v691_v25 = vpop.f32.mrf.mxu0  ;;  %v764_v29 = vpop.f32.mrf.mxu1 }
 0x179   : > { %5495 = vst [vmem:[#allocation33_spill] sm:$0xff] %v4973_v14  ;;  %5496 = vst [vmem:[#allocation34_spill] sm:$0xff] %v4976_v19  ;;  %v4978_v33 = vadd.f32 %v691_v25, %v434_v26  ;;  %v4981_v30 = vadd.f32 %v764_v29, %v4931_v23 }
 0x17a   : > { %v695_v34 = vpop.f32.mrf.mxu0  ;;  %v768_v55 = vpop.f32.mrf.mxu1 }
 0x17b   : > { %5497 = vst [vmem:[#allocation35_spill] sm:$0xff] %v4978_v33  ;;  %5498 = vst [vmem:[#allocation36_spill] sm:$0xff] %v4981_v30  ;;  %v4983_v11 = vadd.f32 %v695_v34, %v430_v22  ;;  %v4986_v0 = vadd.f32 %v768_v55, %v4925_v18 }
 0x17c   : > { %v697_v12 = vpop.f32.mrf.mxu0  ;;  %v770_v4 = vpop.f32.mrf.mxu1 }
 0x17d   : > { %5499 = vst [vmem:[#allocation37_spill] sm:$0xff] %v4983_v11  ;;  %5500 = vst [vmem:[#allocation38_spill] sm:$0xff] %v4986_v0  ;;  %v4988_v14 = vadd.f32 %v697_v12, %v434_v26  ;;  %v4991_v15 = vadd.f32 %v770_v4, %v4931_v23  ;;  %v666_v11 = vadd.f32 %v4921_v16, %v430_v22 }
 0x17e   : > { %v699_v19 = vpop.f32.mrf.mxu0  ;;  %v772_v25 = vpop.f32.mrf.mxu1  ;;  %v668_v4 = vadd.f32 %v4927_v20, %v434_v26  ;;  %v741_v20 = vadd.f32 %v4929_v21, %v4931_v23 }
 0x17f   : > { %5501 = vst [vmem:[#allocation39_spill] sm:$0xff] %v4988_v14  ;;  %5502 = vst [vmem:[#allocation40_spill] sm:$0xff] %v4991_v15  ;;  %v4993_v33 = vadd.f32 %v699_v19, %v430_v22  ;;  %v4996_v29 = vadd.f32 %v772_v25, %v4925_v18  ;;  %v739_v22 = vadd.f32 %v4923_v17, %v4925_v18 }
 0x180   : > { %v701_v30 = vpop.f32.mrf.mxu0  ;;  %v774_v34 = vpop.f32.mrf.mxu1 }
 0x181   : > { %5503 = vst [vmem:[#allocation41_spill] sm:$0xff] %v4993_v33  ;;  %5504 = vst [vmem:[#allocation42_spill] sm:$0xff] %v4996_v29  ;;  %v4999_v55 = vadd.f32 %v701_v30, %v434_v26  ;;  %v5002_v0 = vadd.f32 %v774_v34, %v4931_v23  ;;  %v1124_v23 = vstv %s1123_s22  ;;  %s3036_s22 = scalar_select %p3035_p8, 1, 0 }
 0x182   : > { %v1045_v12 = vpop.f32.mrf.mxu0  ;;  %v1086_v14 = vpop.f32.mrf.mxu1  ;;  %vm1125_vm0 = vcmp.eq.s32.totalorder %v1124_v23, 1 }
 0x183   : > { %v1093_v15 = vadd.f32 %v1045_v12, %v666_v11  ;;  %v1095_v30 = vadd.f32 %v1086_v14, %v739_v22 }
 0x184   : > { %v1047_v24 = vpop.f32.mrf.mxu0  ;;  %v1088_v19 = vpop.f32.mrf.mxu1 }
 0x185   : > { %v3631_v33 = vmul.f32 -1.442695, %v1093_v15  ;;  %v1094_v13 = vadd.f32 %v1047_v24, %v668_v4  ;;  %v3633_v26 = vmul.f32 -1.442695, %v1095_v30  ;;  %v1096_v34 = vadd.f32 %v1088_v19, %v741_v20 }
 0x186   : > { %v1049_v25 = vpop.f32.mrf.mxu0  ;;  %v1090_v29 = vpop.f32.mrf.mxu1  ;;  %v5505_v20 = vmov 0  }
 0x187   : > { %4155 = vpow2.f32 %v3631_v33  ;;  %v3632_v10 = vmul.f32 -1.442695, %v1094_v13 }
 0x188   : > { %v1050_v46 = vpop.f32.mrf.mxu0  ;;  %v1091_v16 = vpop.f32.mrf.mxu1 }
 0x189   : > { %4157 = vpow2.f32 %v3632_v10  ;;  %v810_v46 = vld [vmem:[#allocation4] sm:$0xff] }
 0x18a   : > { %4159 = vpow2.f32 %v3633_v26 }
 0x194   : > { %v4156_v11 = vpop.eup %4155 }
 0x195   : > { %v1106_v15 = vadd.f32 1.0, %v4156_v11 }
 0x196   : > { %v4158_v24 = vpop.eup %4157 }
 0x197   : > { %4161 = vrcp.f32 %v1106_v15  ;;  %v1107_v33 = vadd.f32 1.0, %v4158_v24  ;;  %v4160_v17 = vpop.eup %4159 }
 0x198   : > { %4163 = vtanh.f32 %v1096_v34  ;;  %v1108_v13 = vadd.f32 1.0, %v4160_v17 }
 0x199   : > { %4165 = vrcp.f32 %v1107_v33 }
 0x19a   : > { %4167 = vrcp.f32 %v1108_v13 }
 0x1a4   : > { %v4162_v18 = vpop.eup %4161 }
 0x1a5   : > { %v4164_v21 = vpop.eup %4163 }
 0x1a6   : > { %v4166_v10 = vpop.eup %4165  ;;  %v1117_v14 = vmul.f32 %v4164_v21, %v4162_v18 }
 0x1a7   : > { %v1116_v29 = vmul.f32 %v4166_v10, %v810_v46  ;;  %v4168_v19 = vpop.eup %4167 }
 0x1a9   : > { %v1118_v12 = vadd.f32 %v1117_v14, %v1116_v29 }
 0x1ab   : > { %4169 = vtanh.f32 %v1118_v12  ;;  %v5013_v4 = vsel %vm1125_vm0, %v1118_v12, %v810_v46 }
 0x1b8   : > { %v4170_v25 = vpop.eup %4169 }
 0x1b9   : > { %v1120_v16 = vmul.f32 %v4170_v25, %v4168_v19 }
 0x1bb   : > { %v5016_v22 = vsel %vm1125_vm0, %v1120_v16, %v4875_v8 }
 0x1bc   : > { %1128 = vst [vmem:[%s4764_s21] sm:$0xff] %v5016_v22  ;;  %v1136_v30 = vpack.c.bf16 %v5016_v22, %v5016_v22 }
 0x1be   : > { %1362 = vmatmul.mubr.bf16.vlgmr.msra.gmra.mxu0 %v1136_v30  ;;  %1403 = vmatmul.mubr.bf16.vlgmr.msra.gmra.mxu1 %v1136_v30 }
 0x1bf   : > { %1649 = vmatpush1.bf16.msra.mxu0 %v4778_v38  ;;  %1690 = vmatpush1.bf16.msra.mxu1 %v4780_v39 }
 0x1c0   : > { %1650 = vmatprep.subr.bf16.mxu0 %v4784_v40  ;;  %1691 = vmatprep.subr.bf16.mxu1 %v4786_v41 }
 0x1c1   : > { %1680 = vmatprep.mubr.bf16.mxu0 %v5505_v20  ;;  %1721 = vmatprep.mubr.bf16.mxu1 %v5505_v20 }
 0x1c3   : > { %1651 = vmatpush1.bf16.msra.mxu0 %v4788_v42  ;;  %1692 = vmatpush1.bf16.msra.mxu1 %v4792_v43 }
 0x1c4   : > { %1652 = vmatprep.subr.bf16.mxu0 %v4796_v44  ;;  %1693 = vmatprep.subr.bf16.mxu1 %v4798_v45 }
 0x1c7   : > { %1653 = vmatpush1.bf16.msra.mxu0 %v4803_v47  ;;  %1694 = vmatpush1.bf16.msra.mxu1 %v4805_v48 }
 0x1c8   : > { %1654 = vmatprep.subr.bf16.mxu0 %v4809_v49  ;;  %1695 = vmatprep.subr.bf16.mxu1 %v4813_v50 }
 0x1cb   : > { %1655 = vmatpush1.bf16.msra.mxu0 %v4815_v51  ;;  %1696 = vmatpush1.bf16.msra.mxu1 %v4817_v52 }
 0x1cc   : > { %1656 = vmatprep.subr.bf16.mxu0 %v4821_v53  ;;  %1697 = vmatprep.subr.bf16.mxu1 %v4825_v54 }
 0x1cf   : > { %1657 = vmatpush1.bf16.msra.mxu0 %v4830_v56  ;;  %1698 = vmatpush1.bf16.msra.mxu1 %v4832_v57 }
 0x1d0   : > { %1658 = vmatprep.subr.bf16.mxu0 %v4834_v58  ;;  %1699 = vmatprep.subr.bf16.mxu1 %v4836_v59 }
 0x1d3   : > { %1659 = vmatpush1.bf16.msra.mxu0 %v4842_v60  ;;  %1700 = vmatpush1.bf16.msra.mxu1 %v4844_v61 }
 0x1d4   : > { %1660 = vmatprep.subr.bf16.mxu0 %v4846_v62  ;;  %1701 = vmatprep.subr.bf16.mxu1 %v4848_v63 }
 0x1d7   : > { %1661 = vmatpush1.bf16.msra.mxu0 %v4857_v1  ;;  %1702 = vmatpush1.bf16.msra.mxu1 %v4859_v2 }
 0x1d8   : > { %1662 = vmatprep.subr.bf16.mxu0 %v4861_v3  ;;  %1703 = vmatprep.subr.bf16.mxu1 %v4863_v5 }
 0x1db   : > { %1663 = vmatpush1.bf16.msra.mxu0 %v4871_v6  ;;  %1704 = vmatpush1.bf16.msra.mxu1 %v4873_v7 }
 0x1dc   : > { %1967 = vmatprep.subr.bf16.mxu0 %v4773_v35  ;;  %2008 = vmatprep.subr.bf16.mxu1 %v4775_v36 }
 0x27e   : > { %v1363_v8 = vpop.f32.mrf.mxu0  ;;  %v1404_v26 = vpop.f32.mrf.mxu1 }
 0x27f   : > { %v1411_v11 = vadd.f32 %v1363_v8, %v4933_v27  ;;  %v1413_v35 = vadd.f32 %v1404_v26, %v4936_v28  ;;  %v1442_v28 = vstv %s1441_s14  ;;  %s3355_s14 = scalar_select %p3354_p11, 1, 0 }
 0x280   : > { %v1365_v34 = vpop.f32.mrf.mxu0  ;;  %v1406_v15 = vpop.f32.mrf.mxu1  ;;  %vm1443_vm1 = vcmp.eq.s32.totalorder %v1442_v28, 1  ;;  %v5162_v28 = vld [vmem:[#allocation10 + $0x88] ss:$16 sps:$4 sm:$0xff]  }
 0x281   : > { %v3667_v24 = vmul.f32 -1.442695, %v1411_v11  ;;  %v1412_v33 = vadd.f32 %v1365_v34, %v4938_v31  ;;  %v3669_v36 = vmul.f32 -1.442695, %v1413_v35  ;;  %v1414_v10 = vadd.f32 %v1406_v15, %v4941_v32  ;;  %v5128_v35 = vld [vmem:[#allocation10 + $0xe8] ss:$16 sps:$4 sm:$0xff]  }
 0x282   : > { %v1367_v17 = vpop.f32.mrf.mxu0  ;;  %v1408_v18 = vpop.f32.mrf.mxu1 }
 0x283   : > { %4171 = vpow2.f32 %v3667_v24  ;;  %v3668_v46 = vmul.f32 -1.442695, %v1412_v33 }
 0x284   : > { %v1368_v21 = vpop.f32.mrf.mxu0  ;;  %v1409_v23 = vpop.f32.mrf.mxu1 }
 0x285   : > { %4173 = vpow2.f32 %v3668_v46  ;;  %v5122_v46 = vld [vmem:[#allocation10 + $0xe4] ss:$16 sps:$4 sm:$0xff]   ;;  %v5124_v21 = vld [vmem:[#allocation10 + $0xec] ss:$16 sps:$4 sm:$0xff]   ;;  %v5126_v23 = vld [vmem:[#allocation10 + $0xe0] ss:$16 sps:$4 sm:$0xff]  }
 0x286   : > { %4175 = vpow2.f32 %v3669_v36  ;;  %v5134_v36 = vld [vmem:[#allocation10 + $0xc4] ss:$16 sps:$4 sm:$0xff]  }
 0x287   : > { %4177 = vtanh.f32 %v1414_v10  ;;  %v5136_v10 = vld [vmem:[#allocation10 + $0xcc] ss:$16 sps:$4 sm:$0xff]  }
 0x290   : > { %v4172_v13 = vpop.eup %4171 }
 0x291   : > { %v1424_v27 = vadd.f32 1.0, %v4172_v13  ;;  %v5138_v13 = vld [vmem:[#allocation10 + $0xc0] ss:$16 sps:$4 sm:$0xff]  }
 0x292   : > { %v4174_v14 = vpop.eup %4173 }
 0x293   : > { %4179 = vrcp.f32 %v1424_v27  ;;  %v1425_v31 = vadd.f32 1.0, %v4174_v14  ;;  %v4176_v29 = vpop.eup %4175  ;;  %v5140_v27 = vld [vmem:[#allocation10 + $0xc8] ss:$16 sps:$4 sm:$0xff]   ;;  %v5146_v14 = vld [vmem:[#allocation10 + $0xa4] ss:$16 sps:$4 sm:$0xff]  }
 0x294   : > { %v4178_v12 = vpop.eup %4177  ;;  %v1426_v30 = vadd.f32 1.0, %v4176_v29  ;;  %v5150_v29 = vld [vmem:[#allocation10 + $0xa0] ss:$16 sps:$4 sm:$0xff]  }
 0x295   : > { %4181 = vrcp.f32 %v1425_v31  ;;  %v5148_v31 = vld [vmem:[#allocation10 + $0xac] ss:$16 sps:$4 sm:$0xff]  }
 0x296   : > { %4183 = vrcp.f32 %v1426_v30  ;;  %v5166_v30 = vld [vmem:[#allocation10 + $0x64] ss:$16 sps:$4 sm:$0xff]  }
 0x2a0   : > { %v4180_v19 = vpop.eup %4179 }
 0x2a1   : > { %v1435_v25 = vmul.f32 %v4180_v19, %v4178_v12  ;;  %v5152_v12 = vld [vmem:[#allocation10 + $0xa8] ss:$16 sps:$4 sm:$0xff]   ;;  %v5158_v19 = vld [vmem:[#allocation10 + $0x80] ss:$16 sps:$4 sm:$0xff]  }
 0x2a2   : > { %v4182_v16 = vpop.eup %4181 }
 0x2a3   : > { %v1434_v32 = vmul.f32 %v4182_v16, %v5013_v4  ;;  %v4184_v11 = vpop.eup %4183  ;;  %v5164_v16 = vld [vmem:[#allocation10 + $0x8c] ss:$16 sps:$4 sm:$0xff]  }
 0x2a5   : > { %v1436_v8 = vadd.f32 %v1435_v25, %v1434_v32  ;;  %v5160_v25 = vld [vmem:[#allocation10 + $0x84] ss:$16 sps:$4 sm:$0xff]   ;;  %v5169_v32 = vld [vmem:[#allocation10 + $0x6c] ss:$16 sps:$4 sm:$0xff]  }
 0x2a7   : > { %4185 = vtanh.f32 %v1436_v8  ;;  %v5063_v26 = vsel %vm1443_vm1, %v1436_v8, %v5013_v4  ;;  %v5173_v8 = vld [vmem:[#allocation10 + $0x60] ss:$16 sps:$4 sm:$0xff]  }
 0x2b4   : > { %v4186_v34 = vpop.eup %4185 }
 0x2b5   : > { %v1438_v15 = vmul.f32 %v4186_v34, %v4184_v11  ;;  %v5179_v11 = vld [vmem:[#allocation10 + $0x44] ss:$16 sps:$4 sm:$0xff]   ;;  %v5182_v34 = vld [vmem:[#allocation10 + $0x4c] ss:$16 sps:$4 sm:$0xff]  }
 0x2b7   : > { %v5066_v24 = vsel %vm1443_vm1, %v1438_v15, %v5016_v22  ;;  %v5185_v15 = vld [vmem:[#allocation10 + $0x40] ss:$16 sps:$4 sm:$0xff]  }
 0x2b8   : > { %3670 = vst [vmem:[%s4764_s21 + $0x8] sm:$0xff] %v5066_v24  ;;  %v1455_v33 = vpack.c.bf16 %v5066_v24, %v5066_v24 }
 0x2ba   : > { %1681 = vmatmul.mubr.bf16.vlgmr.msra.gmra.mxu0 %v1455_v33  ;;  %1722 = vmatmul.mubr.bf16.vlgmr.msra.gmra.mxu1 %v1455_v33  ;;  %v5191_v33 = vld [vmem:[#allocation10 + $0x24] ss:$16 sps:$4 sm:$0xff]  }
 0x2bb   : > { %1968 = vmatpush1.bf16.msra.mxu0 %v4778_v38  ;;  %2009 = vmatpush1.bf16.msra.mxu1 %v4780_v39 }
 0x2bc   : > { %1969 = vmatprep.subr.bf16.mxu0 %v4784_v40  ;;  %2010 = vmatprep.subr.bf16.mxu1 %v4786_v41 }
 0x2bd   : > { %1999 = vmatprep.mubr.bf16.mxu0 %v5505_v20  ;;  %2040 = vmatprep.mubr.bf16.mxu1 %v5505_v20 }
 0x2bf   : > { %1970 = vmatpush1.bf16.msra.mxu0 %v4788_v42  ;;  %2011 = vmatpush1.bf16.msra.mxu1 %v4792_v43 }
 0x2c0   : > { %1971 = vmatprep.subr.bf16.mxu0 %v4796_v44  ;;  %2012 = vmatprep.subr.bf16.mxu1 %v4798_v45 }
 0x2c3   : > { %1972 = vmatpush1.bf16.msra.mxu0 %v4803_v47  ;;  %2013 = vmatpush1.bf16.msra.mxu1 %v4805_v48 }
 0x2c4   : > { %1973 = vmatprep.subr.bf16.mxu0 %v4809_v49  ;;  %2014 = vmatprep.subr.bf16.mxu1 %v4813_v50 }
 0x2c7   : > { %1974 = vmatpush1.bf16.msra.mxu0 %v4815_v51  ;;  %2015 = vmatpush1.bf16.msra.mxu1 %v4817_v52  ;;  %v5506_v51 = vld [vmem:[#allocation23_spill] sm:$0xff] }
 0x2c8   : > { %1975 = vmatprep.subr.bf16.mxu0 %v4821_v53  ;;  %2016 = vmatprep.subr.bf16.mxu1 %v4825_v54  ;;  %v5507_v54 = vld [vmem:[#allocation24_spill] sm:$0xff] }
 0x2cb   : > { %1976 = vmatpush1.bf16.msra.mxu0 %v4830_v56  ;;  %2017 = vmatpush1.bf16.msra.mxu1 %v4832_v57 }
 0x2cc   : > { %1977 = vmatprep.subr.bf16.mxu0 %v4834_v58  ;;  %2018 = vmatprep.subr.bf16.mxu1 %v4836_v59 }
 0x2cf   : > { %1978 = vmatpush1.bf16.msra.mxu0 %v4842_v60  ;;  %2019 = vmatpush1.bf16.msra.mxu1 %v4844_v61 }
 0x2d0   : > { %1979 = vmatprep.subr.bf16.mxu0 %v4846_v62  ;;  %2020 = vmatprep.subr.bf16.mxu1 %v4848_v63 }
 0x2d3   : > { %1980 = vmatpush1.bf16.msra.mxu0 %v4857_v1  ;;  %2021 = vmatpush1.bf16.msra.mxu1 %v4859_v2  ;;  %v1761_v2 = vstv %s1760_s16 }
 0x2d4   : > { %1981 = vmatprep.subr.bf16.mxu0 %v4861_v3  ;;  %2022 = vmatprep.subr.bf16.mxu1 %v4863_v5  ;;  %vm1762_vm2 = vcmp.eq.s32.totalorder %v1761_v2, 1 }
 0x2d7   : > { %1982 = vmatpush1.bf16.msra.mxu0 %v4871_v6  ;;  %2023 = vmatpush1.bf16.msra.mxu1 %v4873_v7 }
 0x2d8   : > { %2286 = vmatprep.subr.bf16.mxu0 %v5122_v46  ;;  %2327 = vmatprep.subr.bf16.mxu1 %v5124_v21 }
 0x37a   : > { %v1682_v38 = vpop.f32.mrf.mxu0  ;;  %v1723_v39 = vpop.f32.mrf.mxu1 }
 0x37b   : > { %v1730_v40 = vadd.f32 %v1682_v38, %v4943_v37  ;;  %v1732_v52 = vadd.f32 %v1723_v39, %v5506_v51  ;;  %v5194_v38 = vld [vmem:[#allocation10 + $0x2c] ss:$16 sps:$4 sm:$0xff]   ;;  %v5197_v39 = vld [vmem:[#allocation10 + $0x20] ss:$16 sps:$4 sm:$0xff]  }
 0x37c   : > { %v1684_v41 = vpop.f32.mrf.mxu0  ;;  %v1725_v42 = vpop.f32.mrf.mxu1 }
 0x37d   : > { %v3703_v43 = vmul.f32 -1.442695, %v1730_v40  ;;  %v1731_v44 = vadd.f32 %v1684_v41, %v4948_v9  ;;  %v3705_v53 = vmul.f32 -1.442695, %v1732_v52  ;;  %v1733_v56 = vadd.f32 %v1725_v42, %v5507_v54  ;;  %v5201_v40 = vld [vmem:[#allocation10 + $0x28] ss:$16 sps:$4 sm:$0xff]  }
 0x37e   : > { %v1686_v45 = vpop.f32.mrf.mxu0  ;;  %v1727_v47 = vpop.f32.mrf.mxu1  ;;  %v5203_v41 = vld [vmem:[#allocation10 + $0x4] ss:$16 sps:$4 sm:$0xff]   ;;  %v5206_v42 = vld [vmem:[#allocation10 + $0xc] ss:$16 sps:$4 sm:$0xff]  }
 0x37f   : > { %4187 = vpow2.f32 %v3703_v43  ;;  %v3704_v48 = vmul.f32 -1.442695, %v1731_v44  ;;  %v5209_v43 = vld [vmem:[#allocation10] ss:$16 sps:$4 sm:$0xff]   ;;  %v5213_v44 = vld [vmem:[#allocation10 + $0x8] ss:$16 sps:$4 sm:$0xff]  }
 0x380   : > { %v1687_v49 = vpop.f32.mrf.mxu0  ;;  %v1728_v50 = vpop.f32.mrf.mxu1 }
 0x381   : > { %4189 = vpow2.f32 %v3704_v48  ;;  %v5508_v48 = vld [vmem:[#allocation25_spill] sm:$0xff] }
 0x382   : > { %4191 = vpow2.f32 %v3705_v53  ;;  %v5509_v53 = vld [vmem:[#allocation27_spill] sm:$0xff] }
 0x383   : > { %4193 = vtanh.f32 %v1733_v56 }
 0x38c   : > { %v4188_v57 = vpop.eup %4187 }
 0x38d   : > { %v1743_v58 = vadd.f32 1.0, %v4188_v57 }
 0x38e   : > { %v4190_v59 = vpop.eup %4189 }
 0x38f   : > { %4195 = vrcp.f32 %v1743_v58  ;;  %v1744_v60 = vadd.f32 1.0, %v4190_v59  ;;  %v4192_v61 = vpop.eup %4191 }
 0x390   : > { %v4194_v62 = vpop.eup %4193  ;;  %v1745_v5 = vadd.f32 1.0, %v4192_v61  ;;  %v5510_v61 = vld [vmem:[#allocation26_spill] sm:$0xff] }
 0x391   : > { %4197 = vrcp.f32 %v1744_v60 }
 0x392   : > { %4199 = vrcp.f32 %v1745_v5 }
 0x39c   : > { %v4196_v63 = vpop.eup %4195 }
 0x39d   : > { %v1754_v1 = vmul.f32 %v4196_v63, %v4194_v62 }
 0x39e   : > { %v4198_v3 = vpop.eup %4197 }
 0x39f   : > { %v1753_v6 = vmul.f32 %v4198_v3, %v5063_v26  ;;  %v4200_v9 = vpop.eup %4199 }
 0x3a1   : > { %v1755_v7 = vadd.f32 %v1754_v1, %v1753_v6  ;;  %v5511_v1 = vld [vmem:[#allocation28_spill] sm:$0xff] }
 0x3a3   : > { %4201 = vtanh.f32 %v1755_v7  ;;  %v5111_v37 = vsel %vm1762_vm2, %v1755_v7, %v5063_v26  ;;  %v5177_v26 = vld [vmem:[#allocation10 + $0x68] ss:$16 sps:$4 sm:$0xff]  }
 0x3b0   : > { %v4202_v4 = vpop.eup %4201 }
 0x3b1   : > { %v1757_v22 = vmul.f32 %v4202_v4, %v4200_v9 }
 0x3b3   : > { %v5114_v17 = vsel %vm1762_vm2, %v1757_v22, %v5066_v24  ;;  %v5189_v24 = vld [vmem:[#allocation10 + $0x48] ss:$16 sps:$4 sm:$0xff]  }
 0x3b4   : > { %3706 = vst [vmem:[%s4764_s21 + $0x10] sm:$0xff] %v5114_v17  ;;  %v1774_v18 = vpack.c.bf16 %v5114_v17, %v5114_v17 }
 0x3b6   : > { %2000 = vmatmul.mubr.bf16.vlgmr.msra.gmra.mxu0 %v1774_v18  ;;  %2041 = vmatmul.mubr.bf16.vlgmr.msra.gmra.mxu1 %v1774_v18 }
 0x3b7   : > { %2318 = vmatprep.mubr.bf16.mxu0 %v5505_v20  ;;  %2359 = vmatprep.mubr.bf16.mxu1 %v5505_v20 }
 0x3b8   : > { %2287 = vmatpush1.bf16.msra.mxu0 %v5126_v23  ;;  %2328 = vmatpush1.bf16.msra.mxu1 %v5128_v35 }
 0x3b9   : > { %2288 = vmatprep.subr.bf16.mxu0 %v5134_v36  ;;  %2329 = vmatprep.subr.bf16.mxu1 %v5136_v10 }
 0x3bc   : > { %2289 = vmatpush1.bf16.msra.mxu0 %v5138_v13  ;;  %2330 = vmatpush1.bf16.msra.mxu1 %v5140_v27 }
 0x3bd   : > { %2290 = vmatprep.subr.bf16.mxu0 %v5146_v14  ;;  %2331 = vmatprep.subr.bf16.mxu1 %v5148_v31 }
 0x3c0   : > { %2291 = vmatpush1.bf16.msra.mxu0 %v5150_v29  ;;  %2332 = vmatpush1.bf16.msra.mxu1 %v5152_v12 }
 0x3c1   : > { %2292 = vmatprep.subr.bf16.mxu0 %v5160_v25  ;;  %2333 = vmatprep.subr.bf16.mxu1 %v5164_v16 }
 0x3c4   : > { %2293 = vmatpush1.bf16.msra.mxu0 %v5158_v19  ;;  %2334 = vmatpush1.bf16.msra.mxu1 %v5162_v28 }
 0x3c5   : > { %2294 = vmatprep.subr.bf16.mxu0 %v5166_v30  ;;  %2335 = vmatprep.subr.bf16.mxu1 %v5169_v32 }
 0x3c8   : > { %2295 = vmatpush1.bf16.msra.mxu0 %v5173_v8  ;;  %2336 = vmatpush1.bf16.msra.mxu1 %v5177_v26 }
 0x3c9   : > { %2296 = vmatprep.subr.bf16.mxu0 %v5179_v11  ;;  %2337 = vmatprep.subr.bf16.mxu1 %v5182_v34 }
 0x3cc   : > { %2297 = vmatpush1.bf16.msra.mxu0 %v5185_v15  ;;  %2338 = vmatpush1.bf16.msra.mxu1 %v5189_v24 }
 0x3cd   : > { %2298 = vmatprep.subr.bf16.mxu0 %v5191_v33  ;;  %2339 = vmatprep.subr.bf16.mxu1 %v5194_v38 }
 0x3d0   : > { %2299 = vmatpush1.bf16.msra.mxu0 %v5197_v39  ;;  %2340 = vmatpush1.bf16.msra.mxu1 %v5201_v40 }
 0x3d1   : > { %2300 = vmatprep.subr.bf16.mxu0 %v5203_v41  ;;  %2341 = vmatprep.subr.bf16.mxu1 %v5206_v42 }
 0x3d4   : > { %2301 = vmatpush1.bf16.msra.mxu0 %v5209_v43  ;;  %2342 = vmatpush1.bf16.msra.mxu1 %v5213_v44 }
 0x3d5   : > { %2605 = vmatprep.subr.bf16.mxu0 %v5122_v46  ;;  %2646 = vmatprep.subr.bf16.mxu1 %v5124_v21 }
 0x476   : > { %v2001_v45 = vpop.f32.mrf.mxu0  ;;  %v2042_v47 = vpop.f32.mrf.mxu1 }
 0x477   : > { %v2049_v49 = vadd.f32 %v2001_v45, %v5508_v48  ;;  %v2051_v62 = vadd.f32 %v2042_v47, %v5510_v61  ;;  %v2080_v45 = vstv %s2079_s2 }
 0x478   : > { %v2003_v50 = vpop.f32.mrf.mxu0  ;;  %v2044_v51 = vpop.f32.mrf.mxu1  ;;  %vm2081_vm3 = vcmp.eq.s32.totalorder %v2080_v45, 1 }
 0x479   : > { %v3739_v52 = vmul.f32 -1.442695, %v2049_v49  ;;  %v2050_v54 = vadd.f32 %v2003_v50, %v5509_v53  ;;  %v3741_v63 = vmul.f32 -1.442695, %v2051_v62  ;;  %v2052_v2 = vadd.f32 %v2044_v51, %v5511_v1 }
 0x47a   : > { %v2005_v56 = vpop.f32.mrf.mxu0  ;;  %v2046_v57 = vpop.f32.mrf.mxu1 }
 0x47b   : > { %4203 = vpow2.f32 %v3739_v52  ;;  %v3740_v58 = vmul.f32 -1.442695, %v2050_v54 }
 0x47c   : > { %v2006_v59 = vpop.f32.mrf.mxu0  ;;  %v2047_v60 = vpop.f32.mrf.mxu1 }
 0x47d   : > { %4205 = vpow2.f32 %v3740_v58  ;;  %v5512_v58 = vld [vmem:[#allocation29_spill] sm:$0xff] }
 0x47e   : > { %4207 = vpow2.f32 %v3741_v63  ;;  %v5513_v63 = vld [vmem:[#allocation31_spill] sm:$0xff] }
 0x47f   : > { %4209 = vtanh.f32 %v2052_v2 }
 0x488   : > { %v4204_v3 = vpop.eup %4203 }
 0x489   : > { %v2062_v5 = vadd.f32 1.0, %v4204_v3 }
 0x48a   : > { %v4206_v6 = vpop.eup %4205 }
 0x48b   : > { %4211 = vrcp.f32 %v2062_v5  ;;  %v2063_v7 = vadd.f32 1.0, %v4206_v6  ;;  %v4208_v9 = vpop.eup %4207 }
 0x48c   : > { %v4210_v4 = vpop.eup %4209  ;;  %v2064_v48 = vadd.f32 1.0, %v4208_v9  ;;  %v5514_v9 = vld [vmem:[#allocation30_spill] sm:$0xff] }
 0x48d   : > { %4213 = vrcp.f32 %v2063_v7 }
 0x48e   : > { %4215 = vrcp.f32 %v2064_v48 }
 0x498   : > { %v4212_v22 = vpop.eup %4211 }
 0x499   : > { %v2073_v18 = vmul.f32 %v4212_v22, %v4210_v4 }
 0x49a   : > { %v4214_v47 = vpop.eup %4213 }
 0x49b   : > { %v2072_v49 = vmul.f32 %v4214_v47, %v5111_v37  ;;  %v4216_v52 = vpop.eup %4215 }
 0x49d   : > { %v2074_v50 = vadd.f32 %v2073_v18, %v2072_v49  ;;  %v5515_v18 = vld [vmem:[#allocation32_spill] sm:$0xff] }
 0x49f   : > { %4217 = vtanh.f32 %v2074_v50  ;;  %v5227_v51 = vsel %vm2081_vm3, %v2074_v50, %v5111_v37 }
 0x4ac   : > { %v4218_v53 = vpop.eup %4217 }
 0x4ad   : > { %v2076_v54 = vmul.f32 %v4218_v53, %v4216_v52 }
 0x4af   : > { %v5230_v56 = vsel %vm2081_vm3, %v2076_v54, %v5114_v17 }
 0x4b0   : > { %3742 = vst [vmem:[%s4764_s21 + $0x18] sm:$0xff] %v5230_v56  ;;  %v2093_v57 = vpack.c.bf16 %v5230_v56, %v5230_v56 }
 0x4b2   : > { %2319 = vmatmul.mubr.bf16.vlgmr.msra.gmra.mxu0 %v2093_v57  ;;  %2360 = vmatmul.mubr.bf16.vlgmr.msra.gmra.mxu1 %v2093_v57 }
 0x4b3   : > { %2606 = vmatpush1.bf16.msra.mxu0 %v5126_v23  ;;  %2647 = vmatpush1.bf16.msra.mxu1 %v5128_v35 }
 0x4b4   : > { %2607 = vmatprep.subr.bf16.mxu0 %v5134_v36  ;;  %2648 = vmatprep.subr.bf16.mxu1 %v5136_v10 }
 0x4b5   : > { %2637 = vmatprep.mubr.bf16.mxu0 %v5505_v20  ;;  %2678 = vmatprep.mubr.bf16.mxu1 %v5505_v20 }
 0x4b7   : > { %2608 = vmatpush1.bf16.msra.mxu0 %v5138_v13  ;;  %2649 = vmatpush1.bf16.msra.mxu1 %v5140_v27 }
 0x4b8   : > { %2609 = vmatprep.subr.bf16.mxu0 %v5146_v14  ;;  %2650 = vmatprep.subr.bf16.mxu1 %v5148_v31 }
 0x4bb   : > { %2610 = vmatpush1.bf16.msra.mxu0 %v5150_v29  ;;  %2651 = vmatpush1.bf16.msra.mxu1 %v5152_v12 }
 0x4bc   : > { %2611 = vmatprep.subr.bf16.mxu0 %v5160_v25  ;;  %2652 = vmatprep.subr.bf16.mxu1 %v5164_v16 }
 0x4bf   : > { %2612 = vmatpush1.bf16.msra.mxu0 %v5158_v19  ;;  %2653 = vmatpush1.bf16.msra.mxu1 %v5162_v28 }
 0x4c0   : > { %2613 = vmatprep.subr.bf16.mxu0 %v5166_v30  ;;  %2654 = vmatprep.subr.bf16.mxu1 %v5169_v32 }
 0x4c3   : > { %2614 = vmatpush1.bf16.msra.mxu0 %v5173_v8  ;;  %2655 = vmatpush1.bf16.msra.mxu1 %v5177_v26 }
 0x4c4   : > { %2615 = vmatprep.subr.bf16.mxu0 %v5179_v11  ;;  %2656 = vmatprep.subr.bf16.mxu1 %v5182_v34 }
 0x4c7   : > { %2616 = vmatpush1.bf16.msra.mxu0 %v5185_v15  ;;  %2657 = vmatpush1.bf16.msra.mxu1 %v5189_v24 }
 0x4c8   : > { %2617 = vmatprep.subr.bf16.mxu0 %v5191_v33  ;;  %2658 = vmatprep.subr.bf16.mxu1 %v5194_v38 }
 0x4cb   : > { %2618 = vmatpush1.bf16.msra.mxu0 %v5197_v39  ;;  %2659 = vmatpush1.bf16.msra.mxu1 %v5201_v40 }
 0x4cc   : > { %2619 = vmatprep.subr.bf16.mxu0 %v5203_v41  ;;  %2660 = vmatprep.subr.bf16.mxu1 %v5206_v42 }
 0x4cf   : > { %2620 = vmatpush1.bf16.msra.mxu0 %v5209_v43  ;;  %2661 = vmatpush1.bf16.msra.mxu1 %v5213_v44 }
 0x4d0   : > { %2924 = vmatprep.subr.bf16.mxu0 %v5122_v46  ;;  %2965 = vmatprep.subr.bf16.mxu1 %v5124_v21 }
 0x572   : > { %v2320_v37 = vpop.f32.mrf.mxu0  ;;  %v2361_v17 = vpop.f32.mrf.mxu1 }
 0x573   : > { %v2368_v59 = vadd.f32 %v2320_v37, %v5512_v58  ;;  %v2370_v4 = vadd.f32 %v2361_v17, %v5514_v9  ;;  %v2399_v37 = vstv %s2398_s18 }
 0x574   : > { %v2322_v60 = vpop.f32.mrf.mxu0  ;;  %v2363_v61 = vpop.f32.mrf.mxu1  ;;  %vm2400_vm4 = vcmp.eq.s32.totalorder %v2399_v37, 1 }
 0x575   : > { %v3775_v62 = vmul.f32 -1.442695, %v2368_v59  ;;  %v2369_v1 = vadd.f32 %v2322_v60, %v5513_v63  ;;  %v3777_v22 = vmul.f32 -1.442695, %v2370_v4  ;;  %v2371_v45 = vadd.f32 %v2363_v61, %v5515_v18 }
 0x576   : > { %v2324_v2 = vpop.f32.mrf.mxu0  ;;  %v2365_v3 = vpop.f32.mrf.mxu1 }
 0x577   : > { %4219 = vpow2.f32 %v3775_v62  ;;  %v3776_v5 = vmul.f32 -1.442695, %v2369_v1 }
 0x578   : > { %v2325_v6 = vpop.f32.mrf.mxu0  ;;  %v2366_v7 = vpop.f32.mrf.mxu1 }
 0x579   : > { %4221 = vpow2.f32 %v3776_v5  ;;  %v5516_v5 = vld [vmem:[#allocation33_spill] sm:$0xff] }
 0x57a   : > { %4223 = vpow2.f32 %v3777_v22  ;;  %v5517_v22 = vld [vmem:[#allocation35_spill] sm:$0xff] }
 0x57b   : > { %4225 = vtanh.f32 %v2371_v45 }
 0x584   : > { %v4220_v47 = vpop.eup %4219 }
 0x585   : > { %v2381_v48 = vadd.f32 1.0, %v4220_v47 }
 0x586   : > { %v4222_v49 = vpop.eup %4221 }
 0x587   : > { %4227 = vrcp.f32 %v2381_v48  ;;  %v2382_v50 = vadd.f32 1.0, %v4222_v49  ;;  %v4224_v52 = vpop.eup %4223 }
 0x588   : > { %v4226_v53 = vpop.eup %4225  ;;  %v2383_v58 = vadd.f32 1.0, %v4224_v52 }
 0x589   : > { %4229 = vrcp.f32 %v2382_v50 }
 0x58a   : > { %4231 = vrcp.f32 %v2383_v58 }
 0x594   : > { %v4228_v54 = vpop.eup %4227 }
 0x595   : > { %v2392_v57 = vmul.f32 %v4228_v54, %v4226_v53  ;;  %v5519_v53 = vld [vmem:[#allocation36_spill] sm:$0xff] }
 0x596   : > { %v4230_v17 = vpop.eup %4229 }
 0x597   : > { %v2391_v59 = vmul.f32 %v4230_v17, %v5227_v51  ;;  %v4232_v62 = vpop.eup %4231 }
 0x599   : > { %v2393_v60 = vadd.f32 %v2392_v57, %v2391_v59 }
 0x59b   : > { %4233 = vtanh.f32 %v2393_v60  ;;  %v5277_v61 = vsel %vm2400_vm4, %v2393_v60, %v5227_v51 }
 0x5a8   : > { %v4234_v63 = vpop.eup %4233 }
 0x5a9   : > { %v2395_v1 = vmul.f32 %v4234_v63, %v4232_v62 }
 0x5ab   : > { %v5280_v2 = vsel %vm2400_vm4, %v2395_v1, %v5230_v56  ;;  %v2718_v1 = vstv %s2717_s11 }
 0x5ac   : > { %3778 = vst [vmem:[%s4764_s21 + $0x20] sm:$0xff] %v5280_v2  ;;  %v2412_v3 = vpack.c.bf16 %v5280_v2, %v5280_v2  ;;  %vm2719_vm5 = vcmp.eq.s32.totalorder %v2718_v1, 1  ;;  %v5525_v1 = vld [vmem:[#allocation42_spill] sm:$0xff] }
 0x5ae   : > { %2638 = vmatmul.mubr.bf16.vlgmr.msra.gmra.mxu0 %v2412_v3  ;;  %2679 = vmatmul.mubr.bf16.vlgmr.msra.gmra.mxu1 %v2412_v3 }
 0x5af   : > { %2925 = vmatpush1.bf16.msra.mxu0 %v5126_v23  ;;  %2966 = vmatpush1.bf16.msra.mxu1 %v5128_v35 }
 0x5b0   : > { %2926 = vmatprep.subr.bf16.mxu0 %v5134_v36  ;;  %2967 = vmatprep.subr.bf16.mxu1 %v5136_v10 }
 0x5b1   : > { %2956 = vmatprep.mubr.bf16.mxu0 %v5505_v20  ;;  %2997 = vmatprep.mubr.bf16.mxu1 %v5505_v20 }
 0x5b3   : > { %2927 = vmatpush1.bf16.msra.mxu0 %v5138_v13  ;;  %2968 = vmatpush1.bf16.msra.mxu1 %v5140_v27 }
 0x5b4   : > { %2928 = vmatprep.subr.bf16.mxu0 %v5146_v14  ;;  %2969 = vmatprep.subr.bf16.mxu1 %v5148_v31 }
 0x5b7   : > { %2929 = vmatpush1.bf16.msra.mxu0 %v5150_v29  ;;  %2970 = vmatpush1.bf16.msra.mxu1 %v5152_v12 }
 0x5b8   : > { %2930 = vmatprep.subr.bf16.mxu0 %v5160_v25  ;;  %2971 = vmatprep.subr.bf16.mxu1 %v5164_v16 }
 0x5bb   : > { %2931 = vmatpush1.bf16.msra.mxu0 %v5158_v19  ;;  %2972 = vmatpush1.bf16.msra.mxu1 %v5162_v28 }
 0x5bc   : > { %2932 = vmatprep.subr.bf16.mxu0 %v5166_v30  ;;  %2973 = vmatprep.subr.bf16.mxu1 %v5169_v32 }
 0x5bf   : > { %2933 = vmatpush1.bf16.msra.mxu0 %v5173_v8  ;;  %2974 = vmatpush1.bf16.msra.mxu1 %v5177_v26 }
 0x5c0   : > { %2934 = vmatprep.subr.bf16.mxu0 %v5179_v11  ;;  %2975 = vmatprep.subr.bf16.mxu1 %v5182_v34 }
 0x5c3   : > { %2935 = vmatpush1.bf16.msra.mxu0 %v5185_v15  ;;  %2976 = vmatpush1.bf16.msra.mxu1 %v5189_v24 }
 0x5c4   : > { %2936 = vmatprep.subr.bf16.mxu0 %v5191_v33  ;;  %2977 = vmatprep.subr.bf16.mxu1 %v5194_v38 }
 0x5c7   : > { %2937 = vmatpush1.bf16.msra.mxu0 %v5197_v39  ;;  %2978 = vmatpush1.bf16.msra.mxu1 %v5201_v40 }
 0x5c8   : > { %2938 = vmatprep.subr.bf16.mxu0 %v5203_v41  ;;  %2979 = vmatprep.subr.bf16.mxu1 %v5206_v42 }
 0x5cb   : > { %2939 = vmatpush1.bf16.msra.mxu0 %v5209_v43  ;;  %2980 = vmatpush1.bf16.msra.mxu1 %v5213_v44 }
 0x5cc   : > { %3243 = vmatprep.subr.bf16.mxu0 %v5122_v46  ;;  %3284 = vmatprep.subr.bf16.mxu1 %v5124_v21  ;;  %v5518_v46 = vld [vmem:[#allocation34_spill] sm:$0xff] }
 0x66e   : > { %v2639_v51 = vpop.f32.mrf.mxu0  ;;  %v2680_v56 = vpop.f32.mrf.mxu1 }
 0x66f   : > { %v2687_v6 = vadd.f32 %v2639_v51, %v5516_v5  ;;  %v2689_v52 = vadd.f32 %v2680_v56, %v5518_v46 }
 0x670   : > { %v2641_v7 = vpop.f32.mrf.mxu0  ;;  %v2682_v9 = vpop.f32.mrf.mxu1 }
 0x671   : > { %v3811_v4 = vmul.f32 -1.442695, %v2687_v6  ;;  %v2688_v18 = vadd.f32 %v2641_v7, %v5517_v22  ;;  %v3813_v21 = vmul.f32 -1.442695, %v2689_v52  ;;  %v2690_v54 = vadd.f32 %v2682_v9, %v5519_v53 }
 0x672   : > { %v2643_v45 = vpop.f32.mrf.mxu0  ;;  %v2684_v47 = vpop.f32.mrf.mxu1 }
 0x673   : > { %4235 = vpow2.f32 %v3811_v4  ;;  %v3812_v48 = vmul.f32 -1.442695, %v2688_v18 }
 0x674   : > { %v2644_v49 = vpop.f32.mrf.mxu0  ;;  %v2685_v50 = vpop.f32.mrf.mxu1 }
 0x675   : > { %4237 = vpow2.f32 %v3812_v48 }
 0x676   : > { %4239 = vpow2.f32 %v3813_v21  ;;  %v5524_v21 = vld [vmem:[#allocation41_spill] sm:$0xff] }
 0x677   : > { %4241 = vtanh.f32 %v2690_v54 }
 0x680   : > { %v4236_v57 = vpop.eup %4235 }
 0x681   : > { %v2700_v37 = vadd.f32 1.0, %v4236_v57 }
 0x682   : > { %v4238_v17 = vpop.eup %4237 }
 0x683   : > { %4243 = vrcp.f32 %v2700_v37  ;;  %v2701_v58 = vadd.f32 1.0, %v4238_v17  ;;  %v4240_v59 = vpop.eup %4239 }
 0x684   : > { %v4242_v60 = vpop.eup %4241  ;;  %v2702_v51 = vadd.f32 1.0, %v4240_v59 }
 0x685   : > { %4245 = vrcp.f32 %v2701_v58 }
 0x686   : > { %4247 = vrcp.f32 %v2702_v51 }
 0x690   : > { %v4244_v62 = vpop.eup %4243 }
 0x691   : > { %v2711_v63 = vmul.f32 %v4244_v62, %v4242_v60 }
 0x692   : > { %v4246_v3 = vpop.eup %4245 }
 0x693   : > { %v2710_v56 = vmul.f32 %v4246_v3, %v5277_v61  ;;  %v4248_v7 = vpop.eup %4247 }
 0x695   : > { %v2712_v5 = vadd.f32 %v2711_v63, %v2710_v56 }
 0x697   : > { %4249 = vtanh.f32 %v2712_v5  ;;  %v5327_v6 = vsel %vm2719_vm5, %v2712_v5, %v5277_v61 }
 0x6a4   : > { %v4250_v9 = vpop.eup %4249 }
 0x6a5   : > { %v2714_v4 = vmul.f32 %v4250_v9, %v4248_v7 }
 0x6a7   : > { %v5330_v22 = vsel %vm2719_vm5, %v2714_v4, %v5280_v2 }
 0x6a8   : > { %3814 = vst [vmem:[%s4764_s21 + $0x28] sm:$0xff] %v5330_v22  ;;  %v2731_v18 = vpack.c.bf16 %v5330_v22, %v5330_v22 }
 0x6aa   : > { %2957 = vmatmul.mubr.bf16.vlgmr.msra.gmra.mxu0 %v2731_v18  ;;  %2998 = vmatmul.mubr.bf16.vlgmr.msra.gmra.mxu1 %v2731_v18 }
 0x6ab   : > { %3244 = vmatpush1.bf16.msra.mxu0 %v5126_v23  ;;  %3285 = vmatpush1.bf16.msra.mxu1 %v5128_v35  ;;  %v5520_v35 = vld [vmem:[#allocation37_spill] sm:$0xff] }
 0x6ac   : > { %3245 = vmatprep.subr.bf16.mxu0 %v5134_v36  ;;  %3286 = vmatprep.subr.bf16.mxu1 %v5136_v10 }
 0x6ad   : > { %3275 = vmatprep.mubr.bf16.mxu0 %v5505_v20  ;;  %3316 = vmatprep.mubr.bf16.mxu1 %v5505_v20 }
 0x6af   : > { %3246 = vmatpush1.bf16.msra.mxu0 %v5138_v13  ;;  %3287 = vmatpush1.bf16.msra.mxu1 %v5140_v27 }
 0x6b0   : > { %3247 = vmatprep.subr.bf16.mxu0 %v5146_v14  ;;  %3288 = vmatprep.subr.bf16.mxu1 %v5148_v31  ;;  %v5521_v14 = vld [vmem:[#allocation39_spill] sm:$0xff] }
 0x6b3   : > { %3248 = vmatpush1.bf16.msra.mxu0 %v5150_v29  ;;  %3289 = vmatpush1.bf16.msra.mxu1 %v5152_v12 }
 0x6b4   : > { %3249 = vmatprep.subr.bf16.mxu0 %v5160_v25  ;;  %3290 = vmatprep.subr.bf16.mxu1 %v5164_v16  ;;  %v5522_v16 = vld [vmem:[#allocation38_spill] sm:$0xff] }
 0x6b7   : > { %3250 = vmatpush1.bf16.msra.mxu0 %v5158_v19  ;;  %3291 = vmatpush1.bf16.msra.mxu1 %v5162_v28 }
 0x6b8   : > { %3251 = vmatprep.subr.bf16.mxu0 %v5166_v30  ;;  %3292 = vmatprep.subr.bf16.mxu1 %v5169_v32 }
 0x6bb   : > { %3252 = vmatpush1.bf16.msra.mxu0 %v5173_v8  ;;  %3293 = vmatpush1.bf16.msra.mxu1 %v5177_v26  ;;  %v5523_v8 = vld [vmem:[#allocation40_spill] sm:$0xff] }
 0x6bc   : > { %3253 = vmatprep.subr.bf16.mxu0 %v5179_v11  ;;  %3294 = vmatprep.subr.bf16.mxu1 %v5182_v34 }
 0x6bf   : > { %3254 = vmatpush1.bf16.msra.mxu0 %v5185_v15  ;;  %3295 = vmatpush1.bf16.msra.mxu1 %v5189_v24 }
 0x6c0   : > { %3255 = vmatprep.subr.bf16.mxu0 %v5191_v33  ;;  %3296 = vmatprep.subr.bf16.mxu1 %v5194_v38 }
 0x6c3   : > { %3256 = vmatpush1.bf16.msra.mxu0 %v5197_v39  ;;  %3297 = vmatpush1.bf16.msra.mxu1 %v5201_v40 }
 0x6c4   : > { %3257 = vmatprep.subr.bf16.mxu0 %v5203_v41  ;;  %3298 = vmatprep.subr.bf16.mxu1 %v5206_v42  ;;  %v3037_v41 = vstv %s3036_s22 }
 0x6c5   : > { %vm3038_vm6 = vcmp.eq.s32.totalorder %v3037_v41, 1 }
 0x6c7   : > { %3258 = vmatpush1.bf16.msra.mxu0 %v5209_v43  ;;  %3299 = vmatpush1.bf16.msra.mxu1 %v5213_v44 }
 0x76a   : > { %v2958_v20 = vpop.f32.mrf.mxu0  ;;  %v2999_v23 = vpop.f32.mrf.mxu1 }
 0x76b   : > { %v3006_v36 = vadd.f32 %v2958_v20, %v5520_v35  ;;  %v3008_v30 = vadd.f32 %v2999_v23, %v5522_v16  ;;  %v3356_v20 = vstv %s3355_s14 }
 0x76c   : > { %v2960_v10 = vpop.f32.mrf.mxu0  ;;  %v3001_v13 = vpop.f32.mrf.mxu1  ;;  %vm3357_vm7 = vcmp.eq.s32.totalorder %v3356_v20, 1 }
 0x76d   : > { %v3847_v27 = vmul.f32 -1.442695, %v3006_v36  ;;  %v3007_v31 = vadd.f32 %v2960_v10, %v5521_v14  ;;  %v3849_v32 = vmul.f32 -1.442695, %v3008_v30  ;;  %v3009_v26 = vadd.f32 %v3001_v13, %v5523_v8 }
 0x76e   : > { %v2962_v29 = vpop.f32.mrf.mxu0  ;;  %v3003_v12 = vpop.f32.mrf.mxu1 }
 0x76f   : > { %4251 = vpow2.f32 %v3847_v27  ;;  %v3848_v19 = vmul.f32 -1.442695, %v3007_v31 }
 0x770   : > { %v2963_v25 = vpop.f32.mrf.mxu0  ;;  %v3004_v28 = vpop.f32.mrf.mxu1 }
 0x771   : > { %4253 = vpow2.f32 %v3848_v19 }
 0x772   : > { %4255 = vpow2.f32 %v3849_v32 }
 0x773   : > { %4257 = vtanh.f32 %v3009_v26 }
 0x77c   : > { %v4252_v11 = vpop.eup %4251 }
 0x77d   : > { %v3019_v34 = vadd.f32 1.0, %v4252_v11 }
 0x77e   : > { %v4254_v15 = vpop.eup %4253 }
 0x77f   : > { %4259 = vrcp.f32 %v3019_v34  ;;  %v3020_v24 = vadd.f32 1.0, %v4254_v15  ;;  %v4256_v33 = vpop.eup %4255 }
 0x780   : > { %v4258_v38 = vpop.eup %4257  ;;  %v3021_v43 = vadd.f32 1.0, %v4256_v33 }
 0x781   : > { %4261 = vrcp.f32 %v3020_v24 }
 0x782   : > { %4263 = vrcp.f32 %v3021_v43 }
 0x78c   : > { %v4260_v39 = vpop.eup %4259 }
 0x78d   : > { %v3030_v40 = vmul.f32 %v4260_v39, %v4258_v38 }
 0x78e   : > { %v4262_v42 = vpop.eup %4261 }
 0x78f   : > { %v3029_v44 = vmul.f32 %v4262_v42, %v5327_v6  ;;  %v4264_v45 = vpop.eup %4263 }
 0x791   : > { %v3031_v61 = vadd.f32 %v3030_v40, %v3029_v44 }
 0x793   : > { %4265 = vtanh.f32 %v3031_v61  ;;  %v3040_v2 = vsel %vm3038_vm6, %v3031_v61, %v5327_v6 }
 0x7a0   : > { %v4266_v47 = vpop.eup %4265 }
 0x7a1   : > { %v3033_v48 = vmul.f32 %v4266_v47, %v4264_v45 }
 0x7a3   : > { %v3039_v49 = vsel %vm3038_vm6, %v3033_v48, %v5330_v22 }
 0x7a4   : > { %3850 = vst [vmem:[%s4764_s21 + $0x30] sm:$0xff] %v3039_v49  ;;  %v3050_v50 = vpack.c.bf16 %v3039_v49, %v3039_v49 }
 0x7a6   : > { %3276 = vmatmul.mubr.bf16.vlgmr.msra.gmra.mxu0 %v3050_v50  ;;  %3317 = vmatmul.mubr.bf16.vlgmr.msra.gmra.mxu1 %v3050_v50 }
 0x866   : > { %v3277_v46 = vpop.f32.mrf.mxu0  ;;  %v3318_v52 = vpop.f32.mrf.mxu1 }
 0x867   : > { %v3325_v53 = vadd.f32 %v3277_v46, %v5524_v21  ;;  %v3327_v3 = vadd.f32 %v3318_v52, %v5525_v1 }
 0x868   : > { %v3279_v54 = vpop.f32.mrf.mxu0  ;;  %v3320_v57 = vpop.f32.mrf.mxu1 }
 0x869   : > { %v3883_v37 = vmul.f32 -1.442695, %v3325_v53  ;;  %v3326_v17 = vadd.f32 %v3279_v54, %v4999_v55  ;;  %v3885_v51 = vmul.f32 -1.442695, %v3327_v3  ;;  %v3328_v56 = vadd.f32 %v3320_v57, %v5002_v0 }
 0x86a   : > { %v3281_v58 = vpop.f32.mrf.mxu0  ;;  %v3322_v59 = vpop.f32.mrf.mxu1 }
 0x86b   : > { %4267 = vpow2.f32 %v3883_v37  ;;  %v3884_v60 = vmul.f32 -1.442695, %v3326_v17 }
 0x86c   : > { %v3282_v62 = vpop.f32.mrf.mxu0  ;;  %v3323_v63 = vpop.f32.mrf.mxu1 }
 0x86d   : > { %4269 = vpow2.f32 %v3884_v60 }
 0x86e   : > { %4271 = vpow2.f32 %v3885_v51 }
 0x86f   : > { %4273 = vtanh.f32 %v3328_v56 }
 0x878   : > { %v4268_v5 = vpop.eup %4267 }
 0x879   : > { %v3338_v6 = vadd.f32 1.0, %v4268_v5 }
 0x87a   : > { %v4270_v7 = vpop.eup %4269 }
 0x87b   : > { %4275 = vrcp.f32 %v3338_v6  ;;  %v3339_v55 = vadd.f32 1.0, %v4270_v7  ;;  %v4272_v9 = vpop.eup %4271 }
 0x87c   : > { %v4274_v4 = vpop.eup %4273  ;;  %v3340_v35 = vadd.f32 1.0, %v4272_v9 }
 0x87d   : > { %4277 = vrcp.f32 %v3339_v55 }
 0x87e   : > { %4279 = vrcp.f32 %v3340_v35 }
 0x888   : > { %v4276_v22 = vpop.eup %4275 }
 0x889   : > { %v3349_v18 = vmul.f32 %v4276_v22, %v4274_v4 }
 0x88a   : > { %v4278_v23 = vpop.eup %4277 }
 0x88b   : > { %v3348_v0 = vmul.f32 %v4278_v23, %v3040_v2  ;;  %v4280_v13 = vpop.eup %4279 }
 0x88d   : > { %v3350_v36 = vadd.f32 %v3349_v18, %v3348_v0 }
 0x88f   : > { %4281 = vtanh.f32 %v3350_v36  ;;  %v3359_v10 = vsel %vm3357_vm7, %v3350_v36, %v3040_v2 }
 0x890   : > { %3363 = vst [vmem:[#allocation4] sm:$0xff] %v3359_v10 }
 0x89c   : > { %v4282_v27 = vpop.eup %4281  ;;  %3367 = sbr.rel (%p3887_p9) target bundleno = 2210 (0x8a2), region = 72 }
 0x89d   : > { %v3352_v14 = vmul.f32 %v4282_v27, %v4280_v13 }
 0x89f   : > { %v3358_v31 = vsel %vm3357_vm7, %v3352_v14, %v3039_v49 }
 0x8a0   : > { %3886 = vst [vmem:[%s4764_s21 + $0x38] sm:$0xff] %v3358_v31  ;;  %3362 = vst [vmem:[#allocation3] sm:$0xff] %v3358_v31 }
 0x8a1   : > { %3368 = vst [vmem:[#allocation15] sm:$0xff] %v3358_v31  ;;  %3369 = vst [vmem:[#allocation17] sm:$0xff] %v3359_v10 }
 0x8a2 PF: > { %s4551_s26 = smov [#allocation15]   ;;  %s3898_s16 = sshll.u32 %s4622_s9, 10 }
 0x8a3   : > { %s3398_s17 = sshll.u32 %s4551_s26, 4  ;;  %s5388_s15 = scalar_lea.hbm %s5458_s6, %s3898_s16  ;;  %s3399_s17 = int_to_ptr.vmem [resolvable:$true] %s3398_s17 }
 0x8a4   : > { %s4415_s18 = scalar_lea.vmem %s3399_s17, 128  ;;  %p5526_p12 = scmp.eq.s32.totalorder %s4622_s9, 1 }
 0x8a5   : > { %p4416_p2 = scmp.ne.s32.totalorder %s3399_s17, %s4415_s18  ;;  %p4422_p13 = scmp.lt.s32.totalorder %s3399_s17, %s3399_s17 }
 0x8a6   : > { %p4423_p1 = scmp.lt.s32.totalorder %s4415_s18, %s4415_s18 }
 0x8a7   : > { %p4417_p4 = pnand %p4416_p2, %p5526_p12 }
 0x8a8   : > { %p4424_p10 = por %p4423_p1, %p4422_p13 }
 0x8a9   : > { %p4418_p5 = pneg %p4417_p4 }
 0x8ab   : > { %p4425_p0 = pnand %p4424_p10, %p4418_p5 }
 0x8ad   : > { %4428 = shalt.err (!%p4425_p0)
}
 0x8ae   : > { %p5527_p6 = pmov %p5526_p12  ;;  %s3384_s25 = sshll.u32 %s4764_s21, 4  ;;  %s5398_s25 = int_to_ptr.vmem [resolvable:$true] %s3384_s25 }
 0x8af   : > { %s3371_s22 = scalar_lea.sflag [#allocation7], %s4745_s1  ;;  %s4439_s24 = scalar_lea.vmem %s5398_s25, 1024 }
 0x8b0   : > { %3919 = dma.vmem_to_hbm [thread:$0]  (%p5527_p6), %s3399_s17, 128, %s5459_s7, [#allocation16]  }
 0x8b1   : > { %p4440_p3 = scmp.ne.s32.totalorder %s5398_s25, %s4439_s24  ;;  %p5528_p7 = scmp.ne.s32.totalorder %s5476_s23, 0 }
 0x8b2   : > { %s4552_s14 = smov [#allocation14]  }
 0x8b3   : > { %p4441_p8 = pnand %p4440_p3, %p5528_p7  ;;  %s4443_s26 = sshll.u32 %s4552_s14, 4  ;;  %s4444_s26 = int_to_ptr.vmem [resolvable:$false] %s4443_s26 }
 0x8b4   : > { %s4445_s16 = scalar_lea.vmem %s4444_s26, 2048  ;;  %p4446_p9 = scmp.lt.s32.totalorder %s5398_s25, %s4444_s26 }
 0x8b5   : > { %p4442_p11 = pneg %p4441_p8  ;;  %p4447_p2 = scmp.lt.s32.totalorder %s4445_s16, %s4439_s24 }
 0x8b7   : > { %p4448_p12 = por %p4447_p2, %p4446_p9 }
 0x8b9   : > { %p4449_p4 = pnand %p4448_p12, %p4442_p11 }
 0x8bb   : > { %4452 = shalt.err (!%p4449_p4)
}
 0x8bc   : > { %s4453_s21 = scalar_lea.hbm %s5388_s15, 1024  ;;  %s4457_s2 = scalar_lea.hbm %s5458_s6, 2048 }
 0x8bd   : > { %p4454_p5 = scmp.ne.s32.totalorder %s5388_s15, %s4453_s21  ;;  %p4458_p10 = scmp.lt.s32.totalorder %s5388_s15, %s5458_s6 }
 0x8be   : > { %p4459_p0 = scmp.lt.s32.totalorder %s4457_s2, %s4453_s21 }
 0x8bf   : > { %p4455_p13 = pnand %p4454_p5, %p5528_p7 }
 0x8c0   : > { %p4460_p6 = por %p4459_p0, %p4458_p10 }
 0x8c1   : > { %p4456_p1 = pneg %p4455_p13 }
 0x8c3   : > { %p4461_p3 = pnand %p4460_p6, %p4456_p1 }
 0x8c5   : > { %4464 = shalt.err (!%p4461_p3)
}
 0x8c6   : > { %s4553_s11 = smov 128   ;;  %s4554_s24 = smov 8  }
 0x8c7   : > { %3917 = dma.vmem_to_hbm [thread:$0]  (%p5528_p7), %s5398_s25, 1024, %s5388_s15, %s3371_s22, %s4553_s11, %s4553_s11, %s4554_s24  }
 0x8c8   : > { %s4555_s14 = smov [#allocation17]   ;;  %p5529_p11 = scmp.eq.s32.totalorder %s4622_s9, 1 }
 0x8c9   : > { %s3409_s26 = sshll.u32 %s4555_s14, 4  ;;  %s3410_s26 = int_to_ptr.vmem [resolvable:$true] %s3409_s26 }
 0x8ca   : > { %s4465_s16 = scalar_lea.vmem %s3410_s26, 128  ;;  %p4472_p12 = scmp.lt.s32.totalorder %s3410_s26, %s3410_s26 }
 0x8cb   : > { %p4466_p8 = scmp.ne.s32.totalorder %s3410_s26, %s4465_s16  ;;  %p4473_p4 = scmp.lt.s32.totalorder %s4465_s16, %s4465_s16 }
 0x8cd   : > { %p4467_p9 = pnand %p4466_p8, %p5529_p11  ;;  %p4474_p5 = por %p4473_p4, %p4472_p12 }
 0x8cf   : > { %p4468_p2 = pneg %p4467_p9 }
 0x8d1   : > { %p4475_p13 = pnand %p4474_p5, %p4468_p2 }
 0x8d3   : > { %4478 = shalt.err (!%p4475_p13)
}
 0x8d4   : > { %p5530_p1 = pmov %p5529_p11 }
 0x8d6   : > { %3921 = dma.vmem_to_hbm [thread:$0]  (%p5530_p1), %s3410_s26, 128, %s5460_s8, [#allocation16]  }
 0x8d7   : > { %p5531_p7 = pmov %p5530_p1 }
 0x8d8   : > { %p5532_p10 = pmov %p5530_p1 }
 0x8d9   : > { %4518 = dma.done.wait (%p5531_p7), [#allocation16], 256  }
 0x8da   : > { %4520 = vsyncadd (%p5532_p10), [#allocation16], 4294967040 }
 0x8db PF: > { %s3429_s23 = sand.u32 1, %s4527_s27   ;;  %p5533_p0 = scmp.ne.s32.totalorder %s5470_s12, 0 }
 0x8dc   : > { %p5534_p6 = scmp.ge.s32.totalorder %s4539_s30, 2  ;;  %s3430_s1 = scalar_lea.sflag [#allocation7], %s3429_s23 }
 0x8de   : > { %p3945_p3 = pnand %p5534_p6, %p5533_p0 }
 0x8e0   : > { %p3946_p8 = pneg %p3945_p3 }
 0x8e2   : > { %4522 = dma.done.wait (%p3946_p8), %s3430_s1, 1024  }
 0x8e3   : > { %4524 = vsyncadd (%p3946_p8), %s3430_s1, 4294966272  ;;  %p25_p11 = scmp.ge.s32.totalorder %s4690_s20, 4   ;;  %s5535_s27 = smov %s4531_s28 }
 0x8e4   : > { %s5536_s28 = smov %s4535_s29  ;;  %s5537_s29 = smov %s4706_s10 }
 0x8e5   : > { %s5538_s30 = smov %s4690_s20  ;;  %27 = sbr.rel (!%p25_p11) target bundleno = 11 (0xb), region = 144 }
 0x8ea   :  { %3435 = vsyncpa [#allocation6], 1 }
 0x8eb   :  { %3437 = vsyncpa [#allocation6 + $0x1], 1 }
 0x8ec   :  { %3438 = vsyncpa [#allocation9], 1 }
 0x8ed   :  { %3439 = vsyncpa [#allocation12], 1 }
 0x8ee   :  { %3440 = vsyncpa [#allocation7], 1 }
 0x8ef   :  { %3442 = vsyncpa [#allocation7 + $0x1], 1 }
 0x8f0   :  { %3443 = vsyncpa [#allocation16], 1 }

</bundles_post_ra>
